<compile_context>
chip_gen: v6e
topology: v6e:2x2x1
jax: 0.10.0
libtpu: 0.0.40
codegen_flags: <defaults>
</compile_context>

<pallas_src>
import jax
import jax.numpy as jnp
from jax import lax
from jax.experimental import pallas as pl
from jax.experimental.pallas import tpu as pltpu

HIDDEN = 128
FC1 = 64
NUM_CLASSES = 2
OUT_PAD = 128          # lane-dense classifier-head width (>= NUM_CLASSES)
UNROLL_T = 8           # fully unroll the recurrence only for T <= UNROLL_T


def _round_up(v, m):
    return ((v + m - 1) // m) * m


def _lstm_kernel(x_ref, wih_ref, whh_ref, b_ref,
                 w1_ref, b1_ref, w2_ref, b2_ref, out_ref):
    """Full LSTM recurrence + FC head + softmax for one batch tile.

    x_ref   : (T, TB, D)  bf16  time-major input tile (TB multiple of 16)
    wih_ref : (D, 4H)     bf16  input->gates weights (gate order i,f,g,o)
    whh_ref : (H, 4H)     bf16  hidden->gates weights
    b_ref   : (1, 4H)     f32   combined bias (b_ih + b_hh)
    w1_ref  : (H, 64)     bf16 ; b1_ref: (1, 64) f32
    w2_ref  : (64, 128)   f32  ; b2_ref: (1, 128) f32   (zero-padded past class 2)
    out_ref : (TB, 128)   f32   softmax probs, lane-dense (cols >= 2 are zero)
    """
    T, TB, D = x_ref.shape
    H = whh_ref.shape[0]

    # ---- Hoisted input->gates matmul for ALL timesteps (one MXU pass) --------
    x2d = x_ref[...].reshape(T * TB, D)                       # bf16, no cast needed
    gates_x = (jnp.dot(x2d, wih_ref[...], preferred_element_type=jnp.float32)
               + b_ref[...])                                   # (T*TB, 4H) f32

    whh = whh_ref[...]                                         # bf16, loop-invariant

    def step(g_x, h, c):
        gates = g_x + jnp.dot(h.astype(jnp.bfloat16), whh,
                              preferred_element_type=jnp.float32)
        i_g = jax.nn.sigmoid(gates[:, 0 * H:1 * H])
        f_g = jax.nn.sigmoid(gates[:, 1 * H:2 * H])
        g_g = jnp.tanh(gates[:, 2 * H:3 * H])
        o_g = jax.nn.sigmoid(gates[:, 3 * H:4 * H])
        c = f_g * c + i_g * g_g
        h = o_g * jnp.tanh(c)
        return h, c

    # ---- Recurrence: h/c live in vregs ---------------------------------------
    h = jnp.zeros((TB, H), jnp.float32)
    c = jnp.zeros((TB, H), jnp.float32)
    if T <= UNROLL_T:
        for t in range(T):                                     # static, unrolled
            h, c = step(gates_x[t * TB:(t + 1) * TB, :], h, c)
    else:
        def body(t, carry):                                    # bounded live ranges
            hh, cc = carry
            g_x = lax.dynamic_slice_in_dim(gates_x, t * TB, TB, axis=0)
            return step(g_x, hh, cc)
        h, c = lax.fori_loop(0, T, body, (h, c))

    # ---- FC head on the last hidden state (lane-dense 128-wide output) -------
    z = jnp.dot(h.astype(jnp.bfloat16), w1_ref[...],
                preferred_element_type=jnp.float32) + b1_ref[...]
    z = jnp.maximum(z, 0.0)                                    # ReLU
    logits = jnp.dot(z, w2_ref[...],
                     preferred_element_type=jnp.float32) + b2_ref[...]
    logits = jnp.maximum(logits, 0.0)                          # ReLU, (TB, 128)
    # Mask the zero-padded class columns so they contribute 0 to the softmax.
    col = lax.broadcasted_iota(jnp.int32, logits.shape, 1)
    logits = jnp.where(col < NUM_CLASSES, logits, -jnp.inf)
    m = jnp.max(logits, axis=-1, keepdims=True)
    e = jnp.exp(logits - m)
    inv = pl.reciprocal(jnp.sum(e, axis=-1, keepdims=True), approx=True)
    out_ref[...] = (e * inv).astype(out_ref.dtype)


def _choose_tb(B):
    """Batch tile: multiple of 16 (bf16 sublane tile), <= 128 MXU rows.

    Divisor-aware (minimize batch padding) and prefers >= 2 grid programs so both
    TensorCores get work on v7x megacore (zero cost on single-TC v5e/v6e).
    """
    if _round_up(B, 16) <= 16:
        return 16
    best_tb, best_cost = 16, None
    for tb in range(16, 129, 16):
        b_pad = _round_up(B, tb)
        if b_pad // tb < 2:
            continue                        # keep both v7x TensorCores busy
        cost = (b_pad - B, -tb)             # least padding first, then biggest tile
        if best_cost is None or cost < best_cost:
            best_cost, best_tb = cost, tb
    return best_tb


def _vmem_limit_bytes(T, TB, D):
    """Scoped-VMEM request from the lane/sublane-padded, double-buffered blocks."""
    lane = lambda n: _round_up(n, 128)
    H4 = 4 * HIDDEN
    est = 0
    est += T * _round_up(TB, 16) * lane(D) * 2             # x block (bf16)
    est += _round_up(D, 16) * lane(H4) * 2                 # wih (bf16)
    est += _round_up(HIDDEN, 16) * lane(H4) * 2            # whh (bf16)
    est += 8 * lane(H4) * 4                                # bias (f32)
    est += _round_up(HIDDEN, 16) * lane(FC1) * 2           # w1 (bf16)
    est += 8 * lane(FC1) * 4                               # b1 (f32)
    est += _round_up(FC1, 8) * lane(OUT_PAD) * 4           # w2 (f32)
    est += 8 * lane(OUT_PAD) * 4                           # b2 (f32)
    est += _round_up(TB, 8) * lane(OUT_PAD) * 4            # out block (f32)
    est *= 2                                               # double buffering
    # 2x headroom for gates_x / spills; clamp to [32 MiB default, 64 MiB (v7x)].
    return int(min(max(2 * est, 32 * 1024 * 1024), 64 * 1024 * 1024))


def _cost_estimate(B_pad, T, D):
    H, H4 = HIDDEN, 4 * HIDDEN
    flops = (2 * T * B_pad * (D + H) * H4                  # gate matmuls
             + 2 * B_pad * (H * FC1 + FC1 * OUT_PAD))      # FC head
    transcendentals = 5 * T * B_pad * H + B_pad * OUT_PAD  # sigmoids/tanh + exp
    bytes_accessed = (B_pad * T * D * 2                    # x (bf16)
                      + (D + H) * H4 * 2 + H4 * 4          # LSTM weights + bias
                      + H * FC1 * 2 + FC1 * 4
                      + FC1 * OUT_PAD * 4 + OUT_PAD * 4
                      + B_pad * OUT_PAD * 4)               # output
    return pl.CostEstimate(flops=flops, transcendentals=transcendentals,
                           bytes_accessed=bytes_accessed)


@jax.jit
def lstm_forward(x_btd, wih, whh, b, w1, b1, w2, b2):
    """x_btd: (B, T, D) float32 -> (B, NUM_CLASSES) softmax probabilities."""
    B, T, D = x_btd.shape
    TB = _choose_tb(B)
    B_pad = _round_up(B, TB)

    # Fused cast -> transpose -> pad (single XLA op chain before the kernel):
    # bf16 halves x DMA bytes; time-major makes per-step slices sublane-aligned.
    x_tbd = jnp.transpose(x_btd.astype(jnp.bfloat16), (1, 0, 2))   # (T, B, D)
    if B_pad != B:
        x_tbd = jnp.pad(x_tbd, ((0, 0), (0, B_pad - B), (0, 0)))

    # bf16 weights for the MXU; biases / tiny fc2 stay f32 (f32 accumulation).
    wih_b = wih.astype(jnp.bfloat16)
    whh_b = whh.astype(jnp.bfloat16)
    w1_b = w1.astype(jnp.bfloat16)

    # Lane-dense classifier head: pad fc2 out-dim NUM_CLASSES -> OUT_PAD (128).
    w2_p = jnp.pad(w2, ((0, 0), (0, OUT_PAD - NUM_CLASSES)))
    b2_p = jnp.pad(b2, ((0, 0), (0, OUT_PAD - NUM_CLASSES)))

    grid = (B_pad // TB,)

    out = pl.pallas_call(
        _lstm_kernel,
        out_shape=jax.ShapeDtypeStruct((B_pad, OUT_PAD), jnp.float32),
        grid=grid,
        in_specs=[
            pl.BlockSpec((T, TB, D), lambda i: (0, i, 0)),       # x tile (bf16)
            pl.BlockSpec(wih_b.shape, lambda i: (0, 0)),         # wih (D, 4H)
            pl.BlockSpec(whh_b.shape, lambda i: (0, 0)),         # whh (H, 4H)
            pl.BlockSpec(b.shape, lambda i: (0, 0)),             # bias (1, 4H)
            pl.BlockSpec(w1_b.shape, lambda i: (0, 0)),          # w1 (H, 64)
            pl.BlockSpec(b1.shape, lambda i: (0, 0)),            # b1 (1, 64)
            pl.BlockSpec(w2_p.shape, lambda i: (0, 0)),          # w2 (64, 128)
            pl.BlockSpec(b2_p.shape, lambda i: (0, 0)),          # b2 (1, 128)
        ],
        out_specs=pl.BlockSpec((TB, OUT_PAD), lambda i: (i, 0)),  # lane-dense store
        compiler_params=pltpu.CompilerParams(
            dimension_semantics=("parallel",),                    # megacore sharding
            vmem_limit_bytes=_vmem_limit_bytes(T, TB, D),
        ),
        cost_estimate=_cost_estimate(B_pad, T, D),
    )(x_tbd, wih_b, whh_b, b, w1_b, b1, w2_p, b2_p)

    return out[:B, :NUM_CLASSES]


def init_params(key, input_size):
    """Deterministic synthetic params, PyTorch-style uniform(-1/sqrt(H), 1/sqrt(H))."""
    ks = jax.random.split(key, 8)
    s = 1.0 / jnp.sqrt(jnp.float32(HIDDEN))

    def u(k, shape, scale):
        return jax.random.uniform(k, shape, jnp.float32, -scale, scale)

    # LSTM weights, pre-transposed to (in, out); gate order i, f, g, o.
    wih = u(ks[0], (input_size, 4 * HIDDEN), s)
    whh = u(ks[1], (HIDDEN, 4 * HIDDEN), s)
    b_ih = u(ks[2], (1, 4 * HIDDEN), s)
    b_hh = u(ks[3], (1, 4 * HIDDEN), s)
    b = b_ih + b_hh
    # fc1: 128 -> 64, fc2: 64 -> 2 (pre-transposed to (in, out))
    s1 = 1.0 / jnp.sqrt(jnp.float32(HIDDEN))
    s2 = 1.0 / jnp.sqrt(jnp.float32(FC1))
    w1 = u(ks[4], (HIDDEN, FC1), s1)
    b1 = u(ks[5], (1, FC1), s1)
    w2 = u(ks[6], (FC1, NUM_CLASSES), s2)
    b2 = u(ks[7], (1, NUM_CLASSES), s2)
    return wih, whh, b, w1, b1, w2, b2


def _lstm_reference(x, wih, whh, b, w1, b1, w2, b2):
    """Pure-JAX f32 reference of the PyTorch forward pass."""
    B, T, D = x.shape
    h = jnp.zeros((B, HIDDEN), jnp.float32)
    c = jnp.zeros((B, HIDDEN), jnp.float32)
    for t in range(T):
        g = x[:, t, :] @ wih + h @ whh + b
        i = jax.nn.sigmoid(g[:, 0 * HIDDEN:1 * HIDDEN])
        f = jax.nn.sigmoid(g[:, 1 * HIDDEN:2 * HIDDEN])
        gg = jnp.tanh(g[:, 2 * HIDDEN:3 * HIDDEN])
        o = jax.nn.sigmoid(g[:, 3 * HIDDEN:4 * HIDDEN])
        c = f * c + i * gg
        h = o * jnp.tanh(c)
    z = jnp.maximum(h @ w1 + b1, 0.0)
    z = jnp.maximum(z @ w2 + b2, 0.0)
    return jax.nn.softmax(z, axis=-1)


if __name__ == "__main__":
    B, T, D = 4, 8, 32                                      # batch, seq, input_size
    key = jax.random.PRNGKey(0)
    k_x, k_p = jax.random.split(key)
    x = jax.random.normal(k_x, (B, T, D), jnp.float32)
    params = init_params(k_p, D)

    out = jax.block_until_ready(lstm_forward(x, *params))

    assert out.shape == (B, NUM_CLASSES), out.shape
    # Softmax rows sum to 1 (approx reciprocal -> loose tolerance).
    assert jnp.allclose(jnp.sum(out, axis=-1), 1.0, atol=1e-2)
    # Match the f32 reference (bf16 recurrence drift -> loose tolerance).
    ref = _lstm_reference(x, *params)
    assert jnp.allclose(out, ref, atol=5e-2), float(jnp.max(jnp.abs(out - ref)))
    print("KERNEL_OK")
</pallas_src>

<mosaic_0001>
module attributes {stable_mosaic.version = 11 : i64} {
  func.func @_lstm_kernel(%arg0: i32, %arg1: memref<8x16x32xbf16, #tpu.memory_space<vmem>>, %arg2: memref<32x512xbf16, #tpu.memory_space<vmem>>, %arg3: memref<128x512xbf16, #tpu.memory_space<vmem>>, %arg4: memref<1x512xf32, #tpu.memory_space<vmem>>, %arg5: memref<128x64xbf16, #tpu.memory_space<vmem>>, %arg6: memref<1x64xf32, #tpu.memory_space<vmem>>, %arg7: memref<64x128xf32, #tpu.memory_space<vmem>>, %arg8: memref<1x128xf32, #tpu.memory_space<vmem>>, %arg9: memref<16x128xf32, #tpu.memory_space<vmem>>) attributes {dimension_semantics = [#tpu.dimension_semantics<parallel>], iteration_bounds = array<i64: 1>, scalar_prefetch = 0 : i64, scratch_operands = 0 : i64, tpu.core_type = #tpu.core_type<tc>, window_params = [{transform_indices = @transform_0, window_bounds = array<i64: 8, 16, 32>}, {pipeline_mode = #tpu.pipeline_mode<synchronous>, transform_indices = @transform_1, window_bounds = array<i64: 32, 512>}, {pipeline_mode = #tpu.pipeline_mode<synchronous>, transform_indices = @transform_2, window_bounds = array<i64: 128, 512>}, {pipeline_mode = #tpu.pipeline_mode<synchronous>, transform_indices = @transform_3, window_bounds = array<i64: 1, 512>}, {pipeline_mode = #tpu.pipeline_mode<synchronous>, transform_indices = @transform_4, window_bounds = array<i64: 128, 64>}, {pipeline_mode = #tpu.pipeline_mode<synchronous>, transform_indices = @transform_5, window_bounds = array<i64: 1, 64>}, {pipeline_mode = #tpu.pipeline_mode<synchronous>, transform_indices = @transform_6, window_bounds = array<i64: 64, 128>}, {pipeline_mode = #tpu.pipeline_mode<synchronous>, transform_indices = @transform_7, window_bounds = array<i64: 1, 128>}, {transform_indices = @transform_8, window_bounds = array<i64: 16, 128>}]} {
    %c0 = arith.constant 0 : index
    %c0_0 = arith.constant 0 : index
    %c0_1 = arith.constant 0 : index
    %0 = vector.load %arg1[%c0, %c0_0, %c0_1] : memref<8x16x32xbf16, #tpu.memory_space<vmem>>, vector<8x16x32xbf16>
    %1 = vector.shape_cast %0 : vector<8x16x32xbf16> to vector<128x32xbf16>
    %c0_2 = arith.constant 0 : index
    %c0_3 = arith.constant 0 : index
    %2 = vector.load %arg2[%c0_2, %c0_3] : memref<32x512xbf16, #tpu.memory_space<vmem>>, vector<32x512xbf16>
    %cst = arith.constant dense<0.000000e+00> : vector<128x512xf32>
    %3 = tpu.matmul %1, %2, %cst {dimension_numbers = #tpu.dot_dimension_numbers<[1], [0], [0], [1], [0, 0, 1, 1], [], []>} : vector<128x32xbf16>, vector<32x512xbf16>, vector<128x512xf32> -> vector<128x512xf32>
    %c0_4 = arith.constant 0 : index
    %c0_5 = arith.constant 0 : index
    %4 = vector.load %arg4[%c0_4, %c0_5] : memref<1x512xf32, #tpu.memory_space<vmem>>, vector<1x512xf32>
    %5 = vector.broadcast %4 : vector<1x512xf32> to vector<128x512xf32>
    %6 = arith.addf %3, %5 : vector<128x512xf32>
    %c0_6 = arith.constant 0 : index
    %c0_7 = arith.constant 0 : index
    %7 = vector.load %arg3[%c0_6, %c0_7] : memref<128x512xbf16, #tpu.memory_space<vmem>>, vector<128x512xbf16>
    %cst_8 = arith.constant 0.000000e+00 : f32
    %8 = vector.broadcast %cst_8 : f32 to vector<16x128xf32>
    %cst_9 = arith.constant 0.000000e+00 : f32
    %9 = vector.broadcast %cst_9 : f32 to vector<16x128xf32>
    %10 = vector.extract_strided_slice %6 {offsets = [0, 0], sizes = [16, 512], strides = [1, 1]} : vector<128x512xf32> to vector<16x512xf32>
    %11 = arith.truncf %8 : vector<16x128xf32> to vector<16x128xbf16>
    %cst_10 = arith.constant dense<0.000000e+00> : vector<16x512xf32>
    %12 = tpu.matmul %11, %7, %cst_10 {dimension_numbers = #tpu.dot_dimension_numbers<[1], [0], [0], [1], [0, 0, 1, 1], [], []>} : vector<16x128xbf16>, vector<128x512xbf16>, vector<16x512xf32> -> vector<16x512xf32>
    %13 = arith.addf %10, %12 : vector<16x512xf32>
    %14 = vector.extract_strided_slice %13 {offsets = [0, 0], sizes = [16, 128], strides = [1, 1]} : vector<16x512xf32> to vector<16x128xf32>
    %15 = arith.negf %14 : vector<16x128xf32>
    %16 = math.exp %15 : vector<16x128xf32>
    %cst_11 = arith.constant 1.000000e+00 : f32
    %17 = vector.broadcast %cst_11 : f32 to vector<16x128xf32>
    %18 = arith.addf %17, %16 : vector<16x128xf32>
    %19 = arith.divf %17, %18 : vector<16x128xf32>
    %20 = vector.extract_strided_slice %13 {offsets = [0, 128], sizes = [16, 128], strides = [1, 1]} : vector<16x512xf32> to vector<16x128xf32>
    %21 = arith.negf %20 : vector<16x128xf32>
    %22 = math.exp %21 : vector<16x128xf32>
    %cst_12 = arith.constant 1.000000e+00 : f32
    %23 = vector.broadcast %cst_12 : f32 to vector<16x128xf32>
    %24 = arith.addf %23, %22 : vector<16x128xf32>
    %25 = arith.divf %23, %24 : vector<16x128xf32>
    %26 = vector.extract_strided_slice %13 {offsets = [0, 256], sizes = [16, 128], strides = [1, 1]} : vector<16x512xf32> to vector<16x128xf32>
    %27 = math.tanh %26 : vector<16x128xf32>
    %28 = vector.extract_strided_slice %13 {offsets = [0, 384], sizes = [16, 128], strides = [1, 1]} : vector<16x512xf32> to vector<16x128xf32>
    %29 = arith.negf %28 : vector<16x128xf32>
    %30 = math.exp %29 : vector<16x128xf32>
    %cst_13 = arith.constant 1.000000e+00 : f32
    %31 = vector.broadcast %cst_13 : f32 to vector<16x128xf32>
    %32 = arith.addf %31, %30 : vector<16x128xf32>
    %33 = arith.divf %31, %32 : vector<16x128xf32>
    %34 = arith.mulf %25, %9 : vector<16x128xf32>
    %35 = arith.mulf %19, %27 : vector<16x128xf32>
    %36 = arith.addf %34, %35 : vector<16x128xf32>
    %37 = math.tanh %36 : vector<16x128xf32>
    %38 = arith.mulf %33, %37 : vector<16x128xf32>
    %39 = vector.extract_strided_slice %6 {offsets = [16, 0], sizes = [16, 512], strides = [1, 1]} : vector<128x512xf32> to vector<16x512xf32>
    %40 = arith.truncf %38 : vector<16x128xf32> to vector<16x128xbf16>
    %cst_14 = arith.constant dense<0.000000e+00> : vector<16x512xf32>
    %41 = tpu.matmul %40, %7, %cst_14 {dimension_numbers = #tpu.dot_dimension_numbers<[1], [0], [0], [1], [0, 0, 1, 1], [], []>} : vector<16x128xbf16>, vector<128x512xbf16>, vector<16x512xf32> -> vector<16x512xf32>
    %42 = arith.addf %39, %41 : vector<16x512xf32>
    %43 = vector.extract_strided_slice %42 {offsets = [0, 0], sizes = [16, 128], strides = [1, 1]} : vector<16x512xf32> to vector<16x128xf32>
    %44 = arith.negf %43 : vector<16x128xf32>
    %45 = math.exp %44 : vector<16x128xf32>
    %cst_15 = arith.constant 1.000000e+00 : f32
    %46 = vector.broadcast %cst_15 : f32 to vector<16x128xf32>
    %47 = arith.addf %46, %45 : vector<16x128xf32>
    %48 = arith.divf %46, %47 : vector<16x128xf32>
    %49 = vector.extract_strided_slice %42 {offsets = [0, 128], sizes = [16, 128], strides = [1, 1]} : vector<16x512xf32> to vector<16x128xf32>
    %50 = arith.negf %49 : vector<16x128xf32>
    %51 = math.exp %50 : vector<16x128xf32>
    %cst_16 = arith.constant 1.000000e+00 : f32
    %52 = vector.broadcast %cst_16 : f32 to vector<16x128xf32>
    %53 = arith.addf %52, %51 : vector<16x128xf32>
    %54 = arith.divf %52, %53 : vector<16x128xf32>
    %55 = vector.extract_strided_slice %42 {offsets = [0, 256], sizes = [16, 128], strides = [1, 1]} : vector<16x512xf32> to vector<16x128xf32>
    %56 = math.tanh %55 : vector<16x128xf32>
    %57 = vector.extract_strided_slice %42 {offsets = [0, 384], sizes = [16, 128], strides = [1, 1]} : vector<16x512xf32> to vector<16x128xf32>
    %58 = arith.negf %57 : vector<16x128xf32>
    %59 = math.exp %58 : vector<16x128xf32>
    %cst_17 = arith.constant 1.000000e+00 : f32
    %60 = vector.broadcast %cst_17 : f32 to vector<16x128xf32>
    %61 = arith.addf %60, %59 : vector<16x128xf32>
    %62 = arith.divf %60, %61 : vector<16x128xf32>
    %63 = arith.mulf %54, %36 : vector<16x128xf32>
    %64 = arith.mulf %48, %56 : vector<16x128xf32>
    %65 = arith.addf %63, %64 : vector<16x128xf32>
    %66 = math.tanh %65 : vector<16x128xf32>
    %67 = arith.mulf %62, %66 : vector<16x128xf32>
    %68 = vector.extract_strided_slice %6 {offsets = [32, 0], sizes = [16, 512], strides = [1, 1]} : vector<128x512xf32> to vector<16x512xf32>
    %69 = arith.truncf %67 : vector<16x128xf32> to vector<16x128xbf16>
    %cst_18 = arith.constant dense<0.000000e+00> : vector<16x512xf32>
    %70 = tpu.matmul %69, %7, %cst_18 {dimension_numbers = #tpu.dot_dimension_numbers<[1], [0], [0], [1], [0, 0, 1, 1], [], []>} : vector<16x128xbf16>, vector<128x512xbf16>, vector<16x512xf32> -> vector<16x512xf32>
    %71 = arith.addf %68, %70 : vector<16x512xf32>
    %72 = vector.extract_strided_slice %71 {offsets = [0, 0], sizes = [16, 128], strides = [1, 1]} : vector<16x512xf32> to vector<16x128xf32>
    %73 = arith.negf %72 : vector<16x128xf32>
    %74 = math.exp %73 : vector<16x128xf32>
    %cst_19 = arith.constant 1.000000e+00 : f32
    %75 = vector.broadcast %cst_19 : f32 to vector<16x128xf32>
    %76 = arith.addf %75, %74 : vector<16x128xf32>
    %77 = arith.divf %75, %76 : vector<16x128xf32>
    %78 = vector.extract_strided_slice %71 {offsets = [0, 128], sizes = [16, 128], strides = [1, 1]} : vector<16x512xf32> to vector<16x128xf32>
    %79 = arith.negf %78 : vector<16x128xf32>
    %80 = math.exp %79 : vector<16x128xf32>
    %cst_20 = arith.constant 1.000000e+00 : f32
    %81 = vector.broadcast %cst_20 : f32 to vector<16x128xf32>
    %82 = arith.addf %81, %80 : vector<16x128xf32>
    %83 = arith.divf %81, %82 : vector<16x128xf32>
    %84 = vector.extract_strided_slice %71 {offsets = [0, 256], sizes = [16, 128], strides = [1, 1]} : vector<16x512xf32> to vector<16x128xf32>
    %85 = math.tanh %84 : vector<16x128xf32>
    %86 = vector.extract_strided_slice %71 {offsets = [0, 384], sizes = [16, 128], strides = [1, 1]} : vector<16x512xf32> to vector<16x128xf32>
    %87 = arith.negf %86 : vector<16x128xf32>
    %88 = math.exp %87 : vector<16x128xf32>
    %cst_21 = arith.constant 1.000000e+00 : f32
    %89 = vector.broadcast %cst_21 : f32 to vector<16x128xf32>
    %90 = arith.addf %89, %88 : vector<16x128xf32>
    %91 = arith.divf %89, %90 : vector<16x128xf32>
    %92 = arith.mulf %83, %65 : vector<16x128xf32>
    %93 = arith.mulf %77, %85 : vector<16x128xf32>
    %94 = arith.addf %92, %93 : vector<16x128xf32>
    %95 = math.tanh %94 : vector<16x128xf32>
    %96 = arith.mulf %91, %95 : vector<16x128xf32>
    %97 = vector.extract_strided_slice %6 {offsets = [48, 0], sizes = [16, 512], strides = [1, 1]} : vector<128x512xf32> to vector<16x512xf32>
    %98 = arith.truncf %96 : vector<16x128xf32> to vector<16x128xbf16>
    %cst_22 = arith.constant dense<0.000000e+00> : vector<16x512xf32>
    %99 = tpu.matmul %98, %7, %cst_22 {dimension_numbers = #tpu.dot_dimension_numbers<[1], [0], [0], [1], [0, 0, 1, 1], [], []>} : vector<16x128xbf16>, vector<128x512xbf16>, vector<16x512xf32> -> vector<16x512xf32>
    %100 = arith.addf %97, %99 : vector<16x512xf32>
    %101 = vector.extract_strided_slice %100 {offsets = [0, 0], sizes = [16, 128], strides = [1, 1]} : vector<16x512xf32> to vector<16x128xf32>
    %102 = arith.negf %101 : vector<16x128xf32>
    %103 = math.exp %102 : vector<16x128xf32>
    %cst_23 = arith.constant 1.000000e+00 : f32
    %104 = vector.broadcast %cst_23 : f32 to vector<16x128xf32>
    %105 = arith.addf %104, %103 : vector<16x128xf32>
    %106 = arith.divf %104, %105 : vector<16x128xf32>
    %107 = vector.extract_strided_slice %100 {offsets = [0, 128], sizes = [16, 128], strides = [1, 1]} : vector<16x512xf32> to vector<16x128xf32>
    %108 = arith.negf %107 : vector<16x128xf32>
    %109 = math.exp %108 : vector<16x128xf32>
    %cst_24 = arith.constant 1.000000e+00 : f32
    %110 = vector.broadcast %cst_24 : f32 to vector<16x128xf32>
    %111 = arith.addf %110, %109 : vector<16x128xf32>
    %112 = arith.divf %110, %111 : vector<16x128xf32>
    %113 = vector.extract_strided_slice %100 {offsets = [0, 256], sizes = [16, 128], strides = [1, 1]} : vector<16x512xf32> to vector<16x128xf32>
    %114 = math.tanh %113 : vector<16x128xf32>
    %115 = vector.extract_strided_slice %100 {offsets = [0, 384], sizes = [16, 128], strides = [1, 1]} : vector<16x512xf32> to vector<16x128xf32>
    %116 = arith.negf %115 : vector<16x128xf32>
    %117 = math.exp %116 : vector<16x128xf32>
    %cst_25 = arith.constant 1.000000e+00 : f32
    %118 = vector.broadcast %cst_25 : f32 to vector<16x128xf32>
    %119 = arith.addf %118, %117 : vector<16x128xf32>
    %120 = arith.divf %118, %119 : vector<16x128xf32>
    %121 = arith.mulf %112, %94 : vector<16x128xf32>
    %122 = arith.mulf %106, %114 : vector<16x128xf32>
    %123 = arith.addf %121, %122 : vector<16x128xf32>
    %124 = math.tanh %123 : vector<16x128xf32>
    %125 = arith.mulf %120, %124 : vector<16x128xf32>
    %126 = vector.extract_strided_slice %6 {offsets = [64, 0], sizes = [16, 512], strides = [1, 1]} : vector<128x512xf32> to vector<16x512xf32>
    %127 = arith.truncf %125 : vector<16x128xf32> to vector<16x128xbf16>
    %cst_26 = arith.constant dense<0.000000e+00> : vector<16x512xf32>
    %128 = tpu.matmul %127, %7, %cst_26 {dimension_numbers = #tpu.dot_dimension_numbers<[1], [0], [0], [1], [0, 0, 1, 1], [], []>} : vector<16x128xbf16>, vector<128x512xbf16>, vector<16x512xf32> -> vector<16x512xf32>
    %129 = arith.addf %126, %128 : vector<16x512xf32>
    %130 = vector.extract_strided_slice %129 {offsets = [0, 0], sizes = [16, 128], strides = [1, 1]} : vector<16x512xf32> to vector<16x128xf32>
    %131 = arith.negf %130 : vector<16x128xf32>
    %132 = math.exp %131 : vector<16x128xf32>
    %cst_27 = arith.constant 1.000000e+00 : f32
    %133 = vector.broadcast %cst_27 : f32 to vector<16x128xf32>
    %134 = arith.addf %133, %132 : vector<16x128xf32>
    %135 = arith.divf %133, %134 : vector<16x128xf32>
    %136 = vector.extract_strided_slice %129 {offsets = [0, 128], sizes = [16, 128], strides = [1, 1]} : vector<16x512xf32> to vector<16x128xf32>
    %137 = arith.negf %136 : vector<16x128xf32>
    %138 = math.exp %137 : vector<16x128xf32>
    %cst_28 = arith.constant 1.000000e+00 : f32
    %139 = vector.broadcast %cst_28 : f32 to vector<16x128xf32>
    %140 = arith.addf %139, %138 : vector<16x128xf32>
    %141 = arith.divf %139, %140 : vector<16x128xf32>
    %142 = vector.extract_strided_slice %129 {offsets = [0, 256], sizes = [16, 128], strides = [1, 1]} : vector<16x512xf32> to vector<16x128xf32>
    %143 = math.tanh %142 : vector<16x128xf32>
    %144 = vector.extract_strided_slice %129 {offsets = [0, 384], sizes = [16, 128], strides = [1, 1]} : vector<16x512xf32> to vector<16x128xf32>
    %145 = arith.negf %144 : vector<16x128xf32>
    %146 = math.exp %145 : vector<16x128xf32>
    %cst_29 = arith.constant 1.000000e+00 : f32
    %147 = vector.broadcast %cst_29 : f32 to vector<16x128xf32>
    %148 = arith.addf %147, %146 : vector<16x128xf32>
    %149 = arith.divf %147, %148 : vector<16x128xf32>
    %150 = arith.mulf %141, %123 : vector<16x128xf32>
    %151 = arith.mulf %135, %143 : vector<16x128xf32>
    %152 = arith.addf %150, %151 : vector<16x128xf32>
    %153 = math.tanh %152 : vector<16x128xf32>
    %154 = arith.mulf %149, %153 : vector<16x128xf32>
    %155 = vector.extract_strided_slice %6 {offsets = [80, 0], sizes = [16, 512], strides = [1, 1]} : vector<128x512xf32> to vector<16x512xf32>
    %156 = arith.truncf %154 : vector<16x128xf32> to vector<16x128xbf16>
    %cst_30 = arith.constant dense<0.000000e+00> : vector<16x512xf32>
    %157 = tpu.matmul %156, %7, %cst_30 {dimension_numbers = #tpu.dot_dimension_numbers<[1], [0], [0], [1], [0, 0, 1, 1], [], []>} : vector<16x128xbf16>, vector<128x512xbf16>, vector<16x512xf32> -> vector<16x512xf32>
    %158 = arith.addf %155, %157 : vector<16x512xf32>
    %159 = vector.extract_strided_slice %158 {offsets = [0, 0], sizes = [16, 128], strides = [1, 1]} : vector<16x512xf32> to vector<16x128xf32>
    %160 = arith.negf %159 : vector<16x128xf32>
    %161 = math.exp %160 : vector<16x128xf32>
    %cst_31 = arith.constant 1.000000e+00 : f32
    %162 = vector.broadcast %cst_31 : f32 to vector<16x128xf32>
    %163 = arith.addf %162, %161 : vector<16x128xf32>
    %164 = arith.divf %162, %163 : vector<16x128xf32>
    %165 = vector.extract_strided_slice %158 {offsets = [0, 128], sizes = [16, 128], strides = [1, 1]} : vector<16x512xf32> to vector<16x128xf32>
    %166 = arith.negf %165 : vector<16x128xf32>
    %167 = math.exp %166 : vector<16x128xf32>
    %cst_32 = arith.constant 1.000000e+00 : f32
    %168 = vector.broadcast %cst_32 : f32 to vector<16x128xf32>
    %169 = arith.addf %168, %167 : vector<16x128xf32>
    %170 = arith.divf %168, %169 : vector<16x128xf32>
    %171 = vector.extract_strided_slice %158 {offsets = [0, 256], sizes = [16, 128], strides = [1, 1]} : vector<16x512xf32> to vector<16x128xf32>
    %172 = math.tanh %171 : vector<16x128xf32>
    %173 = vector.extract_strided_slice %158 {offsets = [0, 384], sizes = [16, 128], strides = [1, 1]} : vector<16x512xf32> to vector<16x128xf32>
    %174 = arith.negf %173 : vector<16x128xf32>
    %175 = math.exp %174 : vector<16x128xf32>
    %cst_33 = arith.constant 1.000000e+00 : f32
    %176 = vector.broadcast %cst_33 : f32 to vector<16x128xf32>
    %177 = arith.addf %176, %175 : vector<16x128xf32>
    %178 = arith.divf %176, %177 : vector<16x128xf32>
    %179 = arith.mulf %170, %152 : vector<16x128xf32>
    %180 = arith.mulf %164, %172 : vector<16x128xf32>
    %181 = arith.addf %179, %180 : vector<16x128xf32>
    %182 = math.tanh %181 : vector<16x128xf32>
    %183 = arith.mulf %178, %182 : vector<16x128xf32>
    %184 = vector.extract_strided_slice %6 {offsets = [96, 0], sizes = [16, 512], strides = [1, 1]} : vector<128x512xf32> to vector<16x512xf32>
    %185 = arith.truncf %183 : vector<16x128xf32> to vector<16x128xbf16>
    %cst_34 = arith.constant dense<0.000000e+00> : vector<16x512xf32>
    %186 = tpu.matmul %185, %7, %cst_34 {dimension_numbers = #tpu.dot_dimension_numbers<[1], [0], [0], [1], [0, 0, 1, 1], [], []>} : vector<16x128xbf16>, vector<128x512xbf16>, vector<16x512xf32> -> vector<16x512xf32>
    %187 = arith.addf %184, %186 : vector<16x512xf32>
    %188 = vector.extract_strided_slice %187 {offsets = [0, 0], sizes = [16, 128], strides = [1, 1]} : vector<16x512xf32> to vector<16x128xf32>
    %189 = arith.negf %188 : vector<16x128xf32>
    %190 = math.exp %189 : vector<16x128xf32>
    %cst_35 = arith.constant 1.000000e+00 : f32
    %191 = vector.broadcast %cst_35 : f32 to vector<16x128xf32>
    %192 = arith.addf %191, %190 : vector<16x128xf32>
    %193 = arith.divf %191, %192 : vector<16x128xf32>
    %194 = vector.extract_strided_slice %187 {offsets = [0, 128], sizes = [16, 128], strides = [1, 1]} : vector<16x512xf32> to vector<16x128xf32>
    %195 = arith.negf %194 : vector<16x128xf32>
    %196 = math.exp %195 : vector<16x128xf32>
    %cst_36 = arith.constant 1.000000e+00 : f32
    %197 = vector.broadcast %cst_36 : f32 to vector<16x128xf32>
    %198 = arith.addf %197, %196 : vector<16x128xf32>
    %199 = arith.divf %197, %198 : vector<16x128xf32>
    %200 = vector.extract_strided_slice %187 {offsets = [0, 256], sizes = [16, 128], strides = [1, 1]} : vector<16x512xf32> to vector<16x128xf32>
    %201 = math.tanh %200 : vector<16x128xf32>
    %202 = vector.extract_strided_slice %187 {offsets = [0, 384], sizes = [16, 128], strides = [1, 1]} : vector<16x512xf32> to vector<16x128xf32>
    %203 = arith.negf %202 : vector<16x128xf32>
    %204 = math.exp %203 : vector<16x128xf32>
    %cst_37 = arith.constant 1.000000e+00 : f32
    %205 = vector.broadcast %cst_37 : f32 to vector<16x128xf32>
    %206 = arith.addf %205, %204 : vector<16x128xf32>
    %207 = arith.divf %205, %206 : vector<16x128xf32>
    %208 = arith.mulf %199, %181 : vector<16x128xf32>
    %209 = arith.mulf %193, %201 : vector<16x128xf32>
    %210 = arith.addf %208, %209 : vector<16x128xf32>
    %211 = math.tanh %210 : vector<16x128xf32>
    %212 = arith.mulf %207, %211 : vector<16x128xf32>
    %213 = vector.extract_strided_slice %6 {offsets = [112, 0], sizes = [16, 512], strides = [1, 1]} : vector<128x512xf32> to vector<16x512xf32>
    %214 = arith.truncf %212 : vector<16x128xf32> to vector<16x128xbf16>
    %cst_38 = arith.constant dense<0.000000e+00> : vector<16x512xf32>
    %215 = tpu.matmul %214, %7, %cst_38 {dimension_numbers = #tpu.dot_dimension_numbers<[1], [0], [0], [1], [0, 0, 1, 1], [], []>} : vector<16x128xbf16>, vector<128x512xbf16>, vector<16x512xf32> -> vector<16x512xf32>
    %216 = arith.addf %213, %215 : vector<16x512xf32>
    %217 = vector.extract_strided_slice %216 {offsets = [0, 0], sizes = [16, 128], strides = [1, 1]} : vector<16x512xf32> to vector<16x128xf32>
    %218 = arith.negf %217 : vector<16x128xf32>
    %219 = math.exp %218 : vector<16x128xf32>
    %cst_39 = arith.constant 1.000000e+00 : f32
    %220 = vector.broadcast %cst_39 : f32 to vector<16x128xf32>
    %221 = arith.addf %220, %219 : vector<16x128xf32>
    %222 = arith.divf %220, %221 : vector<16x128xf32>
    %223 = vector.extract_strided_slice %216 {offsets = [0, 128], sizes = [16, 128], strides = [1, 1]} : vector<16x512xf32> to vector<16x128xf32>
    %224 = arith.negf %223 : vector<16x128xf32>
    %225 = math.exp %224 : vector<16x128xf32>
    %cst_40 = arith.constant 1.000000e+00 : f32
    %226 = vector.broadcast %cst_40 : f32 to vector<16x128xf32>
    %227 = arith.addf %226, %225 : vector<16x128xf32>
    %228 = arith.divf %226, %227 : vector<16x128xf32>
    %229 = vector.extract_strided_slice %216 {offsets = [0, 256], sizes = [16, 128], strides = [1, 1]} : vector<16x512xf32> to vector<16x128xf32>
    %230 = math.tanh %229 : vector<16x128xf32>
    %231 = vector.extract_strided_slice %216 {offsets = [0, 384], sizes = [16, 128], strides = [1, 1]} : vector<16x512xf32> to vector<16x128xf32>
    %232 = arith.negf %231 : vector<16x128xf32>
    %233 = math.exp %232 : vector<16x128xf32>
    %cst_41 = arith.constant 1.000000e+00 : f32
    %234 = vector.broadcast %cst_41 : f32 to vector<16x128xf32>
    %235 = arith.addf %234, %233 : vector<16x128xf32>
    %236 = arith.divf %234, %235 : vector<16x128xf32>
    %237 = arith.mulf %228, %210 : vector<16x128xf32>
    %238 = arith.mulf %222, %230 : vector<16x128xf32>
    %239 = arith.addf %237, %238 : vector<16x128xf32>
    %240 = math.tanh %239 : vector<16x128xf32>
    %241 = arith.mulf %236, %240 : vector<16x128xf32>
    %242 = arith.truncf %241 : vector<16x128xf32> to vector<16x128xbf16>
    %c0_42 = arith.constant 0 : index
    %c0_43 = arith.constant 0 : index
    %243 = vector.load %arg5[%c0_42, %c0_43] : memref<128x64xbf16, #tpu.memory_space<vmem>>, vector<128x64xbf16>
    %cst_44 = arith.constant dense<0.000000e+00> : vector<16x64xf32>
    %244 = tpu.matmul %242, %243, %cst_44 {dimension_numbers = #tpu.dot_dimension_numbers<[1], [0], [0], [1], [0, 0, 1, 1], [], []>} : vector<16x128xbf16>, vector<128x64xbf16>, vector<16x64xf32> -> vector<16x64xf32>
    %c0_45 = arith.constant 0 : index
    %c0_46 = arith.constant 0 : index
    %245 = vector.load %arg6[%c0_45, %c0_46] : memref<1x64xf32, #tpu.memory_space<vmem>>, vector<1x64xf32>
    %246 = vector.broadcast %245 : vector<1x64xf32> to vector<16x64xf32>
    %247 = arith.addf %244, %246 : vector<16x64xf32>
    %cst_47 = arith.constant 0.000000e+00 : f32
    %248 = vector.broadcast %cst_47 : f32 to vector<16x64xf32>
    %249 = arith.maximumf %247, %248 : vector<16x64xf32>
    %c0_48 = arith.constant 0 : index
    %c0_49 = arith.constant 0 : index
    %250 = vector.load %arg7[%c0_48, %c0_49] : memref<64x128xf32, #tpu.memory_space<vmem>>, vector<64x128xf32>
    %cst_50 = arith.constant dense<0.000000e+00> : vector<16x128xf32>
    %251 = tpu.matmul %249, %250, %cst_50 {dimension_numbers = #tpu.dot_dimension_numbers<[1], [0], [0], [1], [0, 0, 1, 1], [], []>} : vector<16x64xf32>, vector<64x128xf32>, vector<16x128xf32> -> vector<16x128xf32>
    %c0_51 = arith.constant 0 : index
    %c0_52 = arith.constant 0 : index
    %252 = vector.load %arg8[%c0_51, %c0_52] : memref<1x128xf32, #tpu.memory_space<vmem>>, vector<1x128xf32>
    %253 = vector.broadcast %252 : vector<1x128xf32> to vector<16x128xf32>
    %254 = arith.addf %251, %253 : vector<16x128xf32>
    %cst_53 = arith.constant 0.000000e+00 : f32
    %255 = vector.broadcast %cst_53 : f32 to vector<16x128xf32>
    %256 = arith.maximumf %254, %255 : vector<16x128xf32>
    %257 = tpu.iota {dimensions = array<i32: 1>} : vector<16x128xi32>
    %c2_i32 = arith.constant 2 : i32
    %258 = vector.broadcast %c2_i32 : i32 to vector<16x128xi32>
    %259 = arith.cmpi slt, %257, %258 : vector<16x128xi32>
    %cst_54 = arith.constant 0xFF800000 : f32
    %260 = vector.broadcast %cst_54 : f32 to vector<16x128xf32>
    %261 = arith.select %259, %256, %260 : vector<16x128xi1>, vector<16x128xf32>
    %cst_55 = arith.constant dense<0xFF800000> : vector<16xf32>
    %262 = vector.multi_reduction <maximumf>, %261, %cst_55 [1] : vector<16x128xf32> to vector<16xf32>
    %263 = vector.shape_cast %262 : vector<16xf32> to vector<16x1xf32>
    %264 = vector.broadcast %263 : vector<16x1xf32> to vector<16x128xf32>
    %265 = arith.subf %261, %264 : vector<16x128xf32>
    %266 = math.exp %265 : vector<16x128xf32>
    %cst_56 = arith.constant dense<0.000000e+00> : vector<16xf32>
    %267 = vector.multi_reduction <add>, %266, %cst_56 [1] : vector<16x128xf32> to vector<16xf32>
    %268 = vector.shape_cast %267 : vector<16xf32> to vector<16x1xf32>
    %269 = tpu.reciprocal %268 {approx = true} : vector<16x1xf32> -> vector<16x1xf32>
    %270 = vector.broadcast %269 : vector<16x1xf32> to vector<16x128xf32>
    %271 = arith.mulf %266, %270 : vector<16x128xf32>
    %c0_57 = arith.constant 0 : index
    %c0_58 = arith.constant 0 : index
    %272 = vector.load %arg9[%c0_57, %c0_58] : memref<16x128xf32, #tpu.memory_space<vmem>>, vector<16x128xf32>
    tpu.vector_store %arg9[%c0_57, %c0_58], %271 {strides = array<i32>} : memref<16x128xf32, #tpu.memory_space<vmem>>, vector<16x128xf32>,
    return
  }
  func.func @transform_0(%arg0: i32) -> (i32, i32, i32) {
    %c0_i32 = arith.constant 0 : i32
    %c0_i32_0 = arith.constant 0 : i32
    %c0_i32_1 = arith.constant 0 : i32
    return %c0_i32, %arg0, %c0_i32_0 : i32, i32, i32
  }
  func.func @transform_1(%arg0: i32) -> (i32, i32) {
    %c0_i32 = arith.constant 0 : i32
    %c0_i32_0 = arith.constant 0 : i32
    %c0_i32_1 = arith.constant 0 : i32
    return %c0_i32, %c0_i32_0 : i32, i32
  }
  func.func @transform_2(%arg0: i32) -> (i32, i32) {
    %c0_i32 = arith.constant 0 : i32
    %c0_i32_0 = arith.constant 0 : i32
    %c0_i32_1 = arith.constant 0 : i32
    return %c0_i32, %c0_i32_0 : i32, i32
  }
  func.func @transform_3(%arg0: i32) -> (i32, i32) {
    %c0_i32 = arith.constant 0 : i32
    %c0_i32_0 = arith.constant 0 : i32
    %c0_i32_1 = arith.constant 0 : i32
    return %c0_i32, %c0_i32_0 : i32, i32
  }
  func.func @transform_4(%arg0: i32) -> (i32, i32) {
    %c0_i32 = arith.constant 0 : i32
    %c0_i32_0 = arith.constant 0 : i32
    %c0_i32_1 = arith.constant 0 : i32
    return %c0_i32, %c0_i32_0 : i32, i32
  }
  func.func @transform_5(%arg0: i32) -> (i32, i32) {
    %c0_i32 = arith.constant 0 : i32
    %c0_i32_0 = arith.constant 0 : i32
    %c0_i32_1 = arith.constant 0 : i32
    return %c0_i32, %c0_i32_0 : i32, i32
  }
  func.func @transform_6(%arg0: i32) -> (i32, i32) {
    %c0_i32 = arith.constant 0 : i32
    %c0_i32_0 = arith.constant 0 : i32
    %c0_i32_1 = arith.constant 0 : i32
    return %c0_i32, %c0_i32_0 : i32, i32
  }
  func.func @transform_7(%arg0: i32) -> (i32, i32) {
    %c0_i32 = arith.constant 0 : i32
    %c0_i32_0 = arith.constant 0 : i32
    %c0_i32_1 = arith.constant 0 : i32
    return %c0_i32, %c0_i32_0 : i32, i32
  }
  func.func @transform_8(%arg0: i32) -> (i32, i32) {
    %c0_i32 = arith.constant 0 : i32
    %c0_i32_0 = arith.constant 0 : i32
    return %arg0, %c0_i32 : i32, i32
  }
}

</mosaic_0001>

<bundles_post_ra>
// kernel: lstm_forward.1
= control target key start
LH: loop header
LB: loop body
LE: loop exit
PB: predicated region body
PF: predicated region fallthrough
CT: control target
= control target key end

     0   :  { %v3667_v1 = vmov 0   ;;  %vm156_vm0 = vcmask 261120   ;;  %v3666_v49 = vlaneseq  ;;  %vm2548_vm1 = vmmov 0   ;;  %s3657_s1 = inlined_call_operand.vmem [shape: bf16[32,512], index: 1, kind: input, shape index: {}]   ;;  %s3658_s0 = inlined_call_operand.vmem [shape: bf16[8,16,32], index: 0, kind: input, shape index: {}]   ;;  %s3659_s2 = inlined_call_operand.vmem [shape: bf16[128,512], index: 2, kind: input, shape index: {}]   ;;  %s3660_s3 = inlined_call_operand.vmem [shape: f32[1,512], index: 3, kind: input, shape index: {}]   ;;  %s3661_s4 = inlined_call_operand.vmem [shape: bf16[128,64], index: 4, kind: input, shape index: {}]   ;;  %s3662_s6 = inlined_call_operand.vmem [shape: f32[64,128], index: 6, kind: input, shape index: {}]   ;;  %s3663_s5 = inlined_call_operand.vmem [shape: f32[1,64], index: 5, kind: input, shape index: {}]   ;;  %s3664_s7 = inlined_call_operand.vmem [shape: f32[1,128], index: 7, kind: input, shape index: {}]   ;;  %s3665_s8 = inlined_call_operand.vmem [shape: f32[16,128], index: 8, kind: output, shape index: {}]  }
   0x1   :  { %v2174_v0 = vld [vmem:[%s3657_s1 + $0x24] ss:$16 sps:$4 sm:$0xff]   ;;  %213 = vmatprep.mubr.bf16.mxu0 %v3667_v1  ;;  %283 = vmatprep.mubr.bf16.mxu1 %v3667_v1  ;;  %v2176_v2 = vld [vmem:[%s3657_s1 + $0x20] ss:$16 sps:$4 sm:$0xff]   ;;  %v2614_v6 = vld [vmem:[%s3658_s0 + $0x38] sm:$0xff]   ;;  %vm1872_vm2 = vcmask 523264  }
   0x2   :  { %193 = vmatprep.subr.bf16.mxu0 %v2174_v0  ;;  %2167 = vmatprep.subr.bf16.mxu1 %v2174_v0  ;;  %v2177_v3 = vld [vmem:[%s3657_s1 + $0x4] ss:$16 sps:$4 sm:$0xff]   ;;  %v2179_v4 = vld [vmem:[%s3657_s1] ss:$16 sps:$4 sm:$0xff]   ;;  %v2182_v7 = vld [vmem:[%s3657_s1 + $0x28] ss:$16 sps:$4 sm:$0xff]  }
   0x3   :  { %194 = vmatpush1.bf16.msra.mxu0 %v2176_v2  ;;  %2169 = vmatpush1.bf16.msra.mxu1 %v2176_v2  ;;  %v2180_v5 = vld [vmem:[%s3658_s0] sm:$0xff]   ;;  %v2184_v8 = vld [vmem:[%s3657_s1 + $0x2c] ss:$16 sps:$4 sm:$0xff]   ;;  %v2188_v13 = vld [vmem:[%s3657_s1 + $0x8] ss:$16 sps:$4 sm:$0xff]   ;;  %v57_v50 = vshrl.u32 %v3666_v49, 7 }
   0x4   :  { %195 = vmatprep.subr.bf16.mxu0 %v2177_v3  ;;  %2168 = vmatprep.subr.bf16.mxu1 %v2177_v3  ;;  %v2625_v9 = vld [vmem:[%s3659_s2 + $0xe4] ss:$16 sps:$4 sm:$0xff]   ;;  %v2630_v10 = vld [vmem:[%s3659_s2 + $0xe0] ss:$16 sps:$4 sm:$0xff]   ;;  %v2190_v11 = vld [vmem:[%s3657_s1 + $0xc] ss:$16 sps:$4 sm:$0xff]  }
   0x5   :  { %v2639_v12 = vld [vmem:[%s3659_s2 + $0xc4] ss:$16 sps:$4 sm:$0xff]   ;;  %v2651_v14 = vld [vmem:[%s3659_s2 + $0xc0] ss:$16 sps:$4 sm:$0xff]   ;;  %v2657_v15 = vld [vmem:[%s3659_s2 + $0xec] ss:$16 sps:$4 sm:$0xff]  }
   0x6   :  { %v2664_v16 = vld [vmem:[%s3659_s2 + $0xa4] ss:$16 sps:$4 sm:$0xff]   ;;  %v2193_v17 = vld [vmem:[%s3658_s0 + $0x8] sm:$0xff]   ;;  %v2678_v19 = vld [vmem:[%s3659_s2 + $0xa0] ss:$16 sps:$4 sm:$0xff]   ;;  %v58_v51 = vsub.s32 0, %v57_v50 }
   0x7   :  { %196 = vmatpush1.bf16.msra.mxu0 %v2179_v4  ;;  %2170 = vmatpush1.bf16.msra.mxu1 %v2179_v4  ;;  %v2673_v18 = vld [vmem:[%s3659_s2 + $0xe8] ss:$16 sps:$4 sm:$0xff]   ;;  %v2685_v20 = vld [vmem:[%s3659_s2 + $0xcc] ss:$16 sps:$4 sm:$0xff]   ;;  %v2690_v21 = vld [vmem:[%s3659_s2 + $0x84] ss:$16 sps:$4 sm:$0xff]  }
   0x8   :  { %306 = vmatprep.subr.bf16.mxu1 %v2184_v8  ;;  %599 = vmatprep.subr.bf16.mxu0 %v2625_v9  ;;  %v2699_v22 = vld [vmem:[%s3659_s2 + $0xc8] ss:$16 sps:$4 sm:$0xff]   ;;  %v2706_v23 = vld [vmem:[%s3659_s2 + $0x80] ss:$16 sps:$4 sm:$0xff]   ;;  %v2711_v24 = vld [vmem:[%s3659_s2 + $0xac] ss:$16 sps:$4 sm:$0xff]  }
   0x9   :  { %v2718_v25 = vld [vmem:[%s3659_s2 + $0x64] ss:$16 sps:$4 sm:$0xff]   ;;  %v2727_v27 = vld [vmem:[%s3659_s2 + $0xa8] ss:$16 sps:$4 sm:$0xff]   ;;  %v2734_v28 = vld [vmem:[%s3659_s2 + $0x60] ss:$16 sps:$4 sm:$0xff]  }
   0xa   :  { %2001 = vmatmul.mubr.msk.bf16.vlgmr.msra.gmra.mxu0 %vm156_vm0, %v2180_v5  ;;  %2008 = vmatmul.mubr.msk.bf16.vlgmr.msra.gmra.mxu1 %vm156_vm0, %v2614_v6  ;;  %v2201_v26 = vld [vmem:[%s3658_s0 + $0x10] sm:$0xff]   ;;  %v2739_v29 = vld [vmem:[%s3659_s2 + $0x8c] ss:$16 sps:$4 sm:$0xff]   ;;  %v2754_v31 = vld [vmem:[%s3659_s2 + $0x88] ss:$16 sps:$4 sm:$0xff]   ;;  %v62_v52 = vsub.s32 1, %v57_v50 }
   0xb   :  { %307 = vmatpush1.bf16.msra.mxu1 %v2182_v7  ;;  %600 = vmatpush1.bf16.msra.mxu0 %v2630_v10  ;;  %v2745_v30 = vld [vmem:[%s3659_s2 + $0x44] ss:$16 sps:$4 sm:$0xff]   ;;  %v2759_v32 = vld [vmem:[%s3659_s2 + $0x40] ss:$16 sps:$4 sm:$0xff]   ;;  %v2773_v34 = vld [vmem:[%s3659_s2 + $0x6c] ss:$16 sps:$4 sm:$0xff]  }
   0xc   :  { %308 = vmatprep.subr.bf16.mxu1 %v2190_v11  ;;  %223 = vmatprep.mubr.bf16.mxu0 %v3667_v1  ;;  %v2766_v33 = vld [vmem:[%s3659_s2 + $0x24] ss:$16 sps:$4 sm:$0xff]   ;;  %v2208_v35 = vld [vmem:[%s3658_s0 + $0x18] sm:$0xff]   ;;  %v2781_v36 = vld [vmem:[%s3659_s2 + $0x20] ss:$16 sps:$4 sm:$0xff]  }
   0xd   :  { %326 = vmatprep.mubr.bf16.mxu1 %v3667_v1  ;;  %601 = vmatprep.subr.bf16.mxu0 %v2639_v12  ;;  %v2786_v37 = vld [vmem:[%s3659_s2 + $0x68] ss:$16 sps:$4 sm:$0xff]   ;;  %v2793_v38 = vld [vmem:[%s3659_s2 + $0x4] ss:$16 sps:$4 sm:$0xff]   ;;  %v2800_v39 = vld [vmem:[%s3659_s2 + $0x4c] ss:$16 sps:$4 sm:$0xff]  }
   0xe   :  { %v2811_v40 = vld [vmem:[%s3659_s2] ss:$16 sps:$4 sm:$0xff]   ;;  %v2816_v41 = vld [vmem:[%s3659_s2 + $0x48] ss:$16 sps:$4 sm:$0xff]   ;;  %v2823_v42 = vld [vmem:[%s3659_s2 + $0x2c] ss:$16 sps:$4 sm:$0xff]  }
   0xf   :  { %309 = vmatpush1.bf16.msra.mxu1 %v2188_v13  ;;  %602 = vmatpush1.bf16.msra.mxu0 %v2651_v14  ;;  %v2215_v43 = vld [vmem:[%s3658_s0 + $0x20] sm:$0xff]   ;;  %v2833_v44 = vld [vmem:[%s3659_s2 + $0x28] ss:$16 sps:$4 sm:$0xff]   ;;  %v2839_v45 = vld [vmem:[%s3659_s2 + $0xc] ss:$16 sps:$4 sm:$0xff]   ;;  %v66_v13 = vsub.s32 2, %v57_v50 }
  0x10   :  { %642 = vmatprep.subr.bf16.mxu1 %v2657_v15  ;;  %603 = vmatprep.subr.bf16.mxu0 %v2664_v16  ;;  %v2850_v46 = vld [vmem:[%s3659_s2 + $0x8] ss:$16 sps:$4 sm:$0xff]   ;;  %v2229_v48 = vld [vmem:[%s3658_s0 + $0x30] sm:$0xff]   ;;  %v54_v53 = vld [vmem:[%s3660_s3] sm:$0xf] }
  0x11   :  { %v2222_v47 = vld [vmem:[%s3658_s0 + $0x28] sm:$0xff]   ;;  %v2914_v54 = vrot.slane %v54_v53, %v58_v51  ;;  %v2916_v55 = vrot.slane %v54_v53, %v62_v52  ;;  %v2955_v52 = vrot.slane %v54_v53, %v66_v13 }
  0x12   :  { %2002 = vmatmul.mubr.msk.bf16.gmra.mxu0 %vm156_vm0, %v2193_v17  ;;  %2009 = vmatmul.mubr.msk.bf16.vlgmr.msra.gmra.mxu1 %vm156_vm0, %v2180_v5 }
  0x13   :  { %643 = vmatpush1.bf16.msra.mxu1 %v2673_v18  ;;  %233 = vmatprep.mubr.bf16.mxu0 %v3667_v1 }
  0x14   :  { %336 = vmatprep.mubr.bf16.mxu1 %v3667_v1  ;;  %604 = vmatpush1.bf16.msra.mxu0 %v2678_v19 }
  0x15   :  { %644 = vmatprep.subr.bf16.mxu1 %v2685_v20  ;;  %605 = vmatprep.subr.bf16.mxu0 %v2690_v21 }
  0x17   :  { %645 = vmatpush1.bf16.msra.mxu1 %v2699_v22 }
  0x18   :  { %606 = vmatpush1.bf16.msra.mxu0 %v2706_v23  ;;  %646 = vmatprep.subr.bf16.mxu1 %v2711_v24 }
  0x19   :  { %607 = vmatprep.subr.bf16.mxu0 %v2718_v25 }
  0x1a   :  { %2003 = vmatmul.mubr.msk.bf16.gmra.mxu0 %vm156_vm0, %v2201_v26  ;;  %2010 = vmatmul.mubr.msk.bf16.gmra.mxu1 %vm156_vm0, %v2193_v17 }
  0x1b   :  { %243 = vmatprep.mubr.bf16.mxu0 %v3667_v1  ;;  %346 = vmatprep.mubr.bf16.mxu1 %v3667_v1 }
  0x1c   :  { %647 = vmatpush1.bf16.msra.mxu1 %v2727_v27  ;;  %608 = vmatpush1.bf16.msra.mxu0 %v2734_v28 }
  0x1d   :  { %648 = vmatprep.subr.bf16.mxu1 %v2739_v29  ;;  %609 = vmatprep.subr.bf16.mxu0 %v2745_v30 }
  0x20   :  { %649 = vmatpush1.bf16.msra.mxu1 %v2754_v31  ;;  %610 = vmatpush1.bf16.msra.mxu0 %v2759_v32 }
  0x21   :  { %611 = vmatprep.subr.bf16.mxu0 %v2766_v33  ;;  %650 = vmatprep.subr.bf16.mxu1 %v2773_v34 }
  0x22   :  { %2004 = vmatmul.mubr.msk.bf16.gmra.mxu0 %vm156_vm0, %v2208_v35  ;;  %2011 = vmatmul.mubr.msk.bf16.gmra.mxu1 %vm156_vm0, %v2201_v26 }
  0x23   :  { %253 = vmatprep.mubr.bf16.mxu0 %v3667_v1  ;;  %356 = vmatprep.mubr.bf16.mxu1 %v3667_v1 }
  0x24   :  { %612 = vmatpush1.bf16.msra.mxu0 %v2781_v36  ;;  %651 = vmatpush1.bf16.msra.mxu1 %v2786_v37 }
  0x25   :  { %613 = vmatprep.subr.bf16.mxu0 %v2793_v38  ;;  %652 = vmatprep.subr.bf16.mxu1 %v2800_v39 }
  0x28   :  { %614 = vmatpush1.bf16.msra.mxu0 %v2811_v40  ;;  %653 = vmatpush1.bf16.msra.mxu1 %v2816_v41 }
  0x29   :  { %654 = vmatprep.subr.bf16.mxu1 %v2823_v42  ;;  %742 = vmatprep.subr.bf16.mxu0 %v2625_v9 }
  0x2a   :  { %2005 = vmatmul.mubr.msk.bf16.gmra.mxu0 %vm156_vm0, %v2215_v43  ;;  %2012 = vmatmul.mubr.msk.bf16.gmra.mxu1 %vm156_vm0, %v2208_v35 }
  0x2b   :  { %263 = vmatprep.mubr.bf16.mxu0 %v3667_v1  ;;  %366 = vmatprep.mubr.bf16.mxu1 %v3667_v1 }
  0x2c   :  { %655 = vmatpush1.bf16.msra.mxu1 %v2833_v44 }
  0x2d   :  { %656 = vmatprep.subr.bf16.mxu1 %v2839_v45 }
  0x30   :  { %657 = vmatpush1.bf16.msra.mxu1 %v2850_v46 }
  0x31   :  { %785 = vmatprep.subr.bf16.mxu1 %v2657_v15 }
  0x32   :  { %2006 = vmatmul.mubr.msk.bf16.gmra.mxu0 %vm156_vm0, %v2222_v47  ;;  %2013 = vmatmul.mubr.msk.bf16.gmra.mxu1 %vm156_vm0, %v2215_v43  ;;  %v70_v43 = vsub.s32 3, %v57_v50 }
  0x33   :  { %273 = vmatprep.mubr.bf16.mxu0 %v3667_v1  ;;  %376 = vmatprep.mubr.bf16.mxu1 %v3667_v1 }
  0x3a   :  { %2007 = vmatmul.mubr.msk.bf16.gmra.mxu0 %vm156_vm0, %v2229_v48  ;;  %2014 = vmatmul.mubr.msk.bf16.gmra.mxu1 %vm156_vm0, %v2222_v47 }
  0x3b   :  { %386 = vmatprep.mubr.bf16.mxu1 %v3667_v1  ;;  %631 = vmatprep.mubr.bf16.mxu0 %v3667_v1 }
  0x42   :  { %2015 = vmatmul.mubr.msk.bf16.gmra.mxu1 %vm156_vm0, %v2229_v48  ;;  %632 = vmatmul.mubr.bf16.vlgmr.msra.gmra.mxu0 %v3667_v1 }
  0x43   :  { %396 = vmatprep.mubr.bf16.mxu1 %v3667_v1  ;;  %743 = vmatpush1.bf16.msra.mxu0 %v2630_v10 }
  0x44   :  { %744 = vmatprep.subr.bf16.mxu0 %v2639_v12  ;;  %774 = vmatprep.mubr.bf16.mxu0 %v3667_v1 }
  0x47   :  { %745 = vmatpush1.bf16.msra.mxu0 %v2651_v14 }
  0x48   :  { %746 = vmatprep.subr.bf16.mxu0 %v2664_v16 }
  0x4a   :  { %2016 = vmatmul.mubr.msk.bf16.gmra.mxu1 %vm156_vm0, %v2614_v6 }
  0x4b   :  { %674 = vmatprep.mubr.bf16.mxu1 %v3667_v1  ;;  %747 = vmatpush1.bf16.msra.mxu0 %v2678_v19 }
  0x4c   :  { %748 = vmatprep.subr.bf16.mxu0 %v2690_v21 }
  0x4f   :  { %749 = vmatpush1.bf16.msra.mxu0 %v2706_v23 }
  0x50   :  { %750 = vmatprep.subr.bf16.mxu0 %v2718_v25 }
  0x52   :  { %675 = vmatmul.mubr.bf16.vlgmr.msra.gmra.mxu1 %v3667_v1 }
  0x53   :  { %786 = vmatpush1.bf16.msra.mxu1 %v2673_v18  ;;  %751 = vmatpush1.bf16.msra.mxu0 %v2734_v28 }
  0x54   :  { %787 = vmatprep.subr.bf16.mxu1 %v2685_v20  ;;  %752 = vmatprep.subr.bf16.mxu0 %v2745_v30 }
  0x55   :  { %817 = vmatprep.mubr.bf16.mxu1 %v3667_v1 }
  0x57   :  { %788 = vmatpush1.bf16.msra.mxu1 %v2699_v22  ;;  %753 = vmatpush1.bf16.msra.mxu0 %v2759_v32 }
  0x58   :  { %789 = vmatprep.subr.bf16.mxu1 %v2711_v24  ;;  %754 = vmatprep.subr.bf16.mxu0 %v2766_v33 }
  0x5b   :  { %790 = vmatpush1.bf16.msra.mxu1 %v2727_v27  ;;  %755 = vmatpush1.bf16.msra.mxu0 %v2781_v36 }
  0x5c   :  { %791 = vmatprep.subr.bf16.mxu1 %v2739_v29  ;;  %756 = vmatprep.subr.bf16.mxu0 %v2793_v38 }
  0x5f   :  { %792 = vmatpush1.bf16.msra.mxu1 %v2754_v31  ;;  %757 = vmatpush1.bf16.msra.mxu0 %v2811_v40 }
  0x60   :  { %793 = vmatprep.subr.bf16.mxu1 %v2773_v34  ;;  %885 = vmatprep.subr.bf16.mxu0 %v2625_v9 }
  0x63   :  { %794 = vmatpush1.bf16.msra.mxu1 %v2786_v37 }
  0x64   :  { %795 = vmatprep.subr.bf16.mxu1 %v2800_v39 }
  0x67   :  { %796 = vmatpush1.bf16.msra.mxu1 %v2816_v41 }
  0x68   :  { %797 = vmatprep.subr.bf16.mxu1 %v2823_v42 }
  0x6b   :  { %798 = vmatpush1.bf16.msra.mxu1 %v2833_v44 }
  0x6c   :  { %799 = vmatprep.subr.bf16.mxu1 %v2839_v45 }
  0x6f   :  { %800 = vmatpush1.bf16.msra.mxu1 %v2850_v46 }
  0x70   :  { %928 = vmatprep.subr.bf16.mxu1 %v2657_v15 }
  0xca   :  { %v2918_v56 = vpop.f32.mrf.mxu0  ;;  %v285_v57 = vpop.f32.mrf.mxu1 }
  0xcb   :  { %v2921_v58 = vadd.f32 %v285_v57, %v2914_v54 }
  0xcc   :  { %v2923_v59 = vpop.f32.mrf.mxu0  ;;  %v287_v60 = vpop.f32.mrf.mxu1 }
  0xcd   :  { %3669 = vst [vmem:[#allocation2_spill] sm:$0xff] %v2921_v58  ;;  %v2926_v61 = vadd.f32 %v287_v60, %v2916_v55 }
  0xce   :  { %v2928_v62 = vpop.f32.mrf.mxu0  ;;  %v289_v63 = vpop.f32.mrf.mxu1 }
  0xcf   :  { %3670 = vst [vmem:[#allocation3_spill] sm:$0xff] %v2926_v61  ;;  %v2931_v0 = vadd.f32 %v289_v63, %v2914_v54 }
  0xd0   :  { %v2933_v2 = vpop.f32.mrf.mxu0  ;;  %v291_v3 = vpop.f32.mrf.mxu1 }
  0xd1   :  { %3671 = vst [vmem:[#allocation4_spill] sm:$0xff] %v2931_v0  ;;  %v2936_v4 = vadd.f32 %v291_v3, %v2916_v55  ;;  %v2960_v3 = vrot.slane %v54_v53, %v70_v43 }
  0xd2   :  { %v225_v5 = vpop.f32.mrf.mxu0  ;;  %v2938_v6 = vpop.f32.mrf.mxu1 }
  0xd3   :  { %3672 = vst [vmem:[#allocation5_spill] sm:$0xff] %v2936_v4  ;;  %v2941_v7 = vadd.f32 %v225_v5, %v2914_v54 }
  0xd4   :  { %v227_v8 = vpop.f32.mrf.mxu0  ;;  %v2943_v11 = vpop.f32.mrf.mxu1 }
  0xd5   :  { %v2946_v17 = vadd.f32 %v227_v8, %v2916_v55 }
  0xd6   :  { %v229_v26 = vpop.f32.mrf.mxu0  ;;  %v2948_v35 = vpop.f32.mrf.mxu1 }
  0xd7   :  { %v2951_v47 = vadd.f32 %v229_v26, %v2914_v54 }
  0xd8   :  { %v231_v48 = vpop.f32.mrf.mxu0  ;;  %v2953_v51 = vpop.f32.mrf.mxu1 }
  0xd9   :  { %v2958_v57 = vadd.f32 %v231_v48, %v2916_v55 }
  0xda   :  { %v235_v60 = vpop.f32.mrf.mxu0  ;;  %v338_v63 = vpop.f32.mrf.mxu1 }
  0xdb   :  { %v2963_v5 = vadd.f32 %v235_v60, %v2914_v54  ;;  %v2966_v50 = vadd.f32 %v338_v63, %v2955_v52 }
  0xdc   :  { %v237_v8 = vpop.f32.mrf.mxu0  ;;  %v340_v26 = vpop.f32.mrf.mxu1 }
  0xdd   :  { %3673 = vst [vmem:[#allocation6_spill] sm:$0xff] %v2963_v5  ;;  %v2969_v49 = vadd.f32 %v237_v8, %v2916_v55  ;;  %v2972_v13 = vadd.f32 %v340_v26, %v2960_v3 }
  0xde   :  { %v239_v48 = vpop.f32.mrf.mxu0  ;;  %v342_v1 = vpop.f32.mrf.mxu1 }
  0xdf   :  { %3674 = vst [vmem:[#allocation7_spill] sm:$0xff] %v2969_v49  ;;  %v2975_v4 = vadd.f32 %v239_v48, %v2914_v54  ;;  %v2978_v53 = vadd.f32 %v342_v1, %v2955_v52 }
  0xe0   :  { %v241_v43 = vpop.f32.mrf.mxu0  ;;  %v344_v60 = vpop.f32.mrf.mxu1 }
  0xe1   :  { %3675 = vst [vmem:[#allocation8_spill] sm:$0xff] %v2975_v4  ;;  %3676 = vst [vmem:[#allocation9_spill] sm:$0xff] %v2978_v53  ;;  %v2981_v63 = vadd.f32 %v241_v43, %v2916_v55  ;;  %v2984_v0 = vadd.f32 %v344_v60, %v2960_v3 }
  0xe2   :  { %v245_v8 = vpop.f32.mrf.mxu0  ;;  %v348_v61 = vpop.f32.mrf.mxu1 }
  0xe3   :  { %3677 = vst [vmem:[#allocation10_spill] sm:$0xff] %v2981_v63  ;;  %3678 = vst [vmem:[#allocation11_spill] sm:$0xff] %v2984_v0  ;;  %v2987_v26 = vadd.f32 %v245_v8, %v2914_v54  ;;  %v2990_v58 = vadd.f32 %v348_v61, %v2955_v52 }
  0xe4   :  { %v247_v48 = vpop.f32.mrf.mxu0  ;;  %v350_v4 = vpop.f32.mrf.mxu1 }
  0xe5   :  { %3679 = vst [vmem:[#allocation12_spill] sm:$0xff] %v2987_v26  ;;  %3680 = vst [vmem:[#allocation13_spill] sm:$0xff] %v2990_v58  ;;  %v2993_v1 = vadd.f32 %v247_v48, %v2916_v55  ;;  %v2996_v49 = vadd.f32 %v350_v4, %v2960_v3 }
  0xe6   :  { %v249_v43 = vpop.f32.mrf.mxu0  ;;  %v352_v63 = vpop.f32.mrf.mxu1 }
  0xe7   :  { %3681 = vst [vmem:[#allocation14_spill] sm:$0xff] %v2993_v1  ;;  %3682 = vst [vmem:[#allocation15_spill] sm:$0xff] %v2996_v49  ;;  %v2999_v60 = vadd.f32 %v249_v43, %v2914_v54  ;;  %v3002_v5 = vadd.f32 %v352_v63, %v2955_v52 }
  0xe8   :  { %v251_v8 = vpop.f32.mrf.mxu0  ;;  %v354_v26 = vpop.f32.mrf.mxu1 }
  0xe9   :  { %3683 = vst [vmem:[#allocation16_spill] sm:$0xff] %v2999_v60  ;;  %3684 = vst [vmem:[#allocation17_spill] sm:$0xff] %v3002_v5  ;;  %v3005_v61 = vadd.f32 %v251_v8, %v2916_v55  ;;  %v3008_v58 = vadd.f32 %v354_v26, %v2960_v3 }
  0xea   :  { %v255_v48 = vpop.f32.mrf.mxu0  ;;  %v358_v1 = vpop.f32.mrf.mxu1 }
  0xeb   :  { %3685 = vst [vmem:[#allocation18_spill] sm:$0xff] %v3005_v61  ;;  %3686 = vst [vmem:[#allocation19_spill] sm:$0xff] %v3008_v58  ;;  %v3011_v4 = vadd.f32 %v255_v48, %v2914_v54  ;;  %v3014_v49 = vadd.f32 %v358_v1, %v2955_v52 }
  0xec   :  { %v257_v43 = vpop.f32.mrf.mxu0  ;;  %v360_v60 = vpop.f32.mrf.mxu1 }
  0xed   :  { %3687 = vst [vmem:[#allocation20_spill] sm:$0xff] %v3011_v4  ;;  %3688 = vst [vmem:[#allocation21_spill] sm:$0xff] %v3014_v49  ;;  %v3017_v63 = vadd.f32 %v257_v43, %v2916_v55  ;;  %v3020_v5 = vadd.f32 %v360_v60, %v2960_v3 }
  0xee   :  { %v259_v8 = vpop.f32.mrf.mxu0  ;;  %v362_v61 = vpop.f32.mrf.mxu1 }
  0xef   :  { %3689 = vst [vmem:[#allocation22_spill] sm:$0xff] %v3017_v63  ;;  %3690 = vst [vmem:[#allocation23_spill] sm:$0xff] %v3020_v5  ;;  %v3023_v26 = vadd.f32 %v259_v8, %v2914_v54  ;;  %v3026_v58 = vadd.f32 %v362_v61, %v2955_v52 }
  0xf0   :  { %v261_v48 = vpop.f32.mrf.mxu0  ;;  %v364_v4 = vpop.f32.mrf.mxu1 }
  0xf1   :  { %3691 = vst [vmem:[#allocation24_spill] sm:$0xff] %v3023_v26  ;;  %3692 = vst [vmem:[#allocation25_spill] sm:$0xff] %v3026_v58  ;;  %v3029_v1 = vadd.f32 %v261_v48, %v2916_v55  ;;  %v3032_v49 = vadd.f32 %v364_v4, %v2960_v3 }
  0xf2   :  { %v265_v43 = vpop.f32.mrf.mxu0  ;;  %v368_v63 = vpop.f32.mrf.mxu1 }
  0xf3   :  { %3693 = vst [vmem:[#allocation26_spill] sm:$0xff] %v3029_v1  ;;  %3694 = vst [vmem:[#allocation27_spill] sm:$0xff] %v3032_v49  ;;  %v3035_v60 = vadd.f32 %v265_v43, %v2914_v54  ;;  %v3038_v5 = vadd.f32 %v368_v63, %v2955_v52 }
  0xf4   :  { %v267_v8 = vpop.f32.mrf.mxu0  ;;  %v370_v26 = vpop.f32.mrf.mxu1 }
  0xf5   :  { %3695 = vst [vmem:[#allocation28_spill] sm:$0xff] %v3035_v60  ;;  %3696 = vst [vmem:[#allocation29_spill] sm:$0xff] %v3038_v5  ;;  %v3041_v61 = vadd.f32 %v267_v8, %v2916_v55  ;;  %v3044_v58 = vadd.f32 %v370_v26, %v2960_v3 }
  0xf6   :  { %v269_v48 = vpop.f32.mrf.mxu0  ;;  %v372_v1 = vpop.f32.mrf.mxu1 }
  0xf7   :  { %3697 = vst [vmem:[#allocation30_spill] sm:$0xff] %v3041_v61  ;;  %3698 = vst [vmem:[#allocation31_spill] sm:$0xff] %v3044_v58  ;;  %v3047_v4 = vadd.f32 %v269_v48, %v2914_v54  ;;  %v3050_v49 = vadd.f32 %v372_v1, %v2955_v52 }
  0xf8   :  { %v271_v43 = vpop.f32.mrf.mxu0  ;;  %v374_v60 = vpop.f32.mrf.mxu1 }
  0xf9   :  { %3699 = vst [vmem:[#allocation32_spill] sm:$0xff] %v3047_v4  ;;  %3700 = vst [vmem:[#allocation33_spill] sm:$0xff] %v3050_v49  ;;  %v3053_v63 = vadd.f32 %v271_v43, %v2916_v55  ;;  %v3056_v5 = vadd.f32 %v374_v60, %v2960_v3 }
  0xfa   :  { %v275_v8 = vpop.f32.mrf.mxu0  ;;  %v378_v61 = vpop.f32.mrf.mxu1 }
  0xfb   :  { %3701 = vst [vmem:[#allocation34_spill] sm:$0xff] %v3053_v63  ;;  %3702 = vst [vmem:[#allocation35_spill] sm:$0xff] %v3056_v5  ;;  %v3059_v26 = vadd.f32 %v275_v8, %v2914_v54  ;;  %v3062_v58 = vadd.f32 %v378_v61, %v2955_v52  ;;  %v216_v61 = vadd.f32 %v2918_v56, %v2914_v54 }
  0xfc   :  { %v277_v48 = vpop.f32.mrf.mxu0  ;;  %v380_v4 = vpop.f32.mrf.mxu1  ;;  %v220_v56 = vadd.f32 %v2928_v62, %v2914_v54 }
  0xfd   :  { %3703 = vst [vmem:[#allocation36_spill] sm:$0xff] %v3059_v26  ;;  %3704 = vst [vmem:[#allocation37_spill] sm:$0xff] %v3062_v58  ;;  %v3065_v1 = vadd.f32 %v277_v48, %v2916_v55  ;;  %v3068_v49 = vadd.f32 %v380_v4, %v2960_v3 }
  0xfe   :  { %v279_v43 = vpop.f32.mrf.mxu0  ;;  %v382_v63 = vpop.f32.mrf.mxu1 }
  0xff   :  { %3705 = vst [vmem:[#allocation38_spill] sm:$0xff] %v3065_v1  ;;  %3706 = vst [vmem:[#allocation39_spill] sm:$0xff] %v3068_v49  ;;  %v3071_v60 = vadd.f32 %v279_v43, %v2914_v54  ;;  %v3074_v5 = vadd.f32 %v382_v63, %v2955_v52  ;;  %v218_v43 = vadd.f32 %v2923_v59, %v2916_v55 }
 0x100   :  { %v281_v8 = vpop.f32.mrf.mxu0  ;;  %v384_v26 = vpop.f32.mrf.mxu1 }
 0x101   :  { %3707 = vst [vmem:[#allocation40_spill] sm:$0xff] %v3071_v60  ;;  %3708 = vst [vmem:[#allocation41_spill] sm:$0xff] %v3074_v5  ;;  %v3079_v58 = vadd.f32 %v281_v8, %v2916_v55  ;;  %v3082_v48 = vadd.f32 %v384_v26, %v2960_v3 }
 0x102   :  { %v388_v4 = vpop.f32.mrf.mxu1  ;;  %v633_v1 = vpop.f32.mrf.mxu0 }
 0x103   :  { %3709 = vst [vmem:[#allocation42_spill] sm:$0xff] %v3079_v58  ;;  %3710 = vst [vmem:[#allocation43_spill] sm:$0xff] %v3082_v48  ;;  %v3087_v60 = vadd.f32 %v388_v4, %v2955_v52  ;;  %v685_v63 = vadd.f32 %v633_v1, %v216_v61  ;;  %v222_v58 = vadd.f32 %v2933_v2, %v2916_v55 }
 0x104   :  { %v390_v5 = vpop.f32.mrf.mxu1  ;;  %v635_v49 = vpop.f32.mrf.mxu0 }
 0x105   :  { %3711 = vst [vmem:[#allocation44_spill] sm:$0xff] %v3087_v60  ;;  %v2049_v53 = vmul.f32 -1.442695, %v685_v63  ;;  %v3092_v8 = vadd.f32 %v390_v5, %v2960_v3  ;;  %v686_v26 = vadd.f32 %v635_v49, %v218_v43 }
 0x106   :  { %v392_v48 = vpop.f32.mrf.mxu1  ;;  %v637_v0 = vpop.f32.mrf.mxu0 }
 0x107   :  { %2250 = vpow2.f32 %v2049_v53  ;;  %v2051_v59 = vmul.f32 -1.442695, %v686_v26  ;;  %v3097_v4 = vadd.f32 %v392_v48, %v2955_v52  ;;  %v689_v1 = vadd.f32 %v637_v0, %v220_v56 }
 0x108   :  { %v394_v61 = vpop.f32.mrf.mxu1  ;;  %v639_v60 = vpop.f32.mrf.mxu0  ;;  %v331_v26 = vadd.f32 %v2943_v11, %v2960_v3 }
 0x109   :  { %2252 = vpow2.f32 %v2051_v59  ;;  %v2050_v54 = vmul.f32 -1.442695, %v689_v1  ;;  %v3100_v62 = vadd.f32 %v394_v61, %v2960_v3  ;;  %v690_v5 = vadd.f32 %v639_v60, %v222_v58 }
 0x10a   :  { %v398_v49 = vpop.f32.mrf.mxu1  ;;  %v329_v58 = vadd.f32 %v2938_v6, %v2955_v52 }
 0x10b   :  { %2254 = vpow2.f32 %v2050_v54  ;;  %v2052_v43 = vmul.f32 -1.442695, %v690_v5  ;;  %v3103_v55 = vadd.f32 %v398_v49, %v2955_v52 }
 0x10c   :  { %v400_v2 = vpop.f32.mrf.mxu1 }
 0x10d   :  { %2256 = vpow2.f32 %v2052_v43  ;;  %v3106_v53 = vadd.f32 %v400_v2, %v2960_v3  ;;  %v333_v43 = vadd.f32 %v2948_v35, %v2955_v52 }
 0x10e   :  { %v402_v0 = vpop.f32.mrf.mxu1 }
 0x10f   :  { %v3109_v48 = vadd.f32 %v402_v0, %v2955_v52  ;;  %v335_v0 = vadd.f32 %v2953_v51, %v2960_v3 }
 0x110   :  { %v404_v63 = vpop.f32.mrf.mxu1 }
 0x111   :  { %3712 = vst [vmem:[#allocation45_spill] sm:$0xff] %v3109_v48  ;;  %v3112_v56 = vadd.f32 %v404_v63, %v2960_v3 }
 0x112   :  { %v676_v60 = vpop.f32.mrf.mxu1 }
 0x113   :  { %3713 = vst [vmem:[#allocation46_spill] sm:$0xff] %v3112_v56  ;;  %v687_v1 = vadd.f32 %v676_v60, %v329_v58 }
 0x114   :  { %v2251_v59 = vpop.eup %2250  ;;  %v678_v61 = vpop.f32.mrf.mxu1 }
 0x115   :  { %v699_v54 = vadd.f32 1.0, %v2251_v59  ;;  %v688_v5 = vadd.f32 %v678_v61, %v331_v26 }
 0x116   :  { %v2253_v49 = vpop.eup %2252  ;;  %v680_v2 = vpop.f32.mrf.mxu1 }
 0x117   :  { %2258 = vrcp.f32 %v699_v54  ;;  %v711_v63 = vadd.f32 1.0, %v2253_v49  ;;  %v2053_v6 = vmul.f32 -1.442695, %v688_v5  ;;  %v691_v56 = vadd.f32 %v680_v2, %v333_v43 }
 0x118   :  { %v2255_v48 = vpop.eup %2254  ;;  %2260 = vtanh.f32 %v687_v1  ;;  %v682_v11 = vpop.f32.mrf.mxu1 }
 0x119   :  { %2262 = vrcp.f32 %v711_v63  ;;  %v700_v58 = vadd.f32 1.0, %v2255_v48  ;;  %v692_v60 = vadd.f32 %v682_v11, %v335_v0 }
 0x11a   :  { %v2257_v59 = vpop.eup %2256  ;;  %2264 = vpow2.f32 %v2053_v6 }
 0x11b   :  { %2266 = vrcp.f32 %v700_v58  ;;  %v712_v26 = vadd.f32 1.0, %v2257_v59  ;;  %v2054_v61 = vmul.f32 -1.442695, %v692_v60 }
 0x11c   :  { %2268 = vtanh.f32 %v691_v56 }
 0x11d   :  { %2270 = vrcp.f32 %v712_v26 }
 0x11e   :  { %2272 = vpow2.f32 %v2054_v61 }
 0x124   :  { %v2259_v35 = vpop.eup %2258 }
 0x125   :  { %v2261_v51 = vpop.eup %2260 }
 0x126   :  { %v2263_v52 = vpop.eup %2262  ;;  %v733_v5 = vmul.f32 %v2261_v51, %v2259_v35 }
 0x127   :  { %v2265_v3 = vpop.eup %2264  ;;  %v731_v54 = vmul.f32 0.0, %v2263_v52  ;;  %v3714_v52 = vmov 0  }
 0x128   :  { %v2267_v1 = vpop.eup %2266  ;;  %v725_v49 = vadd.f32 1.0, %v2265_v3 }
 0x129   :  { %v2269_v43 = vpop.eup %2268  ;;  %v3122_v2 = vadd.f32 %v733_v5, %v731_v54 }
 0x12a   :  { %v2271_v48 = vpop.eup %2270  ;;  %v734_v6 = vmul.f32 %v2269_v43, %v2267_v1  ;;  %2274 = vrcp.f32 %v725_v49 }
 0x12b   :  { %v2273_v0 = vpop.eup %2272  ;;  %v732_v63 = vmul.f32 0.0, %v2271_v48  ;;  %2276 = vtanh.f32 %v3122_v2 }
 0x12c   :  { %v726_v11 = vadd.f32 1.0, %v2273_v0 }
 0x12d   :  { %v3125_v56 = vadd.f32 %v734_v6, %v732_v63 }
 0x12e   :  { %2278 = vrcp.f32 %v726_v11 }
 0x12f   :  { %2280 = vtanh.f32 %v3125_v56 }
 0x137   :  { %v2275_v58 = vpop.eup %2274 }
 0x138   :  { %v2277_v60 = vpop.eup %2276 }
 0x139   :  { %v739_v61 = vmul.f32 %v2277_v60, %v2275_v58 }
 0x13b   :  { %v2279_v59 = vpop.eup %2278 }
 0x13c   :  { %v2281_v26 = vpop.eup %2280 }
 0x13d   :  { %v740_v35 = vmul.f32 %v2281_v26, %v2279_v59 }
 0x13f   :  { %v741_v51 = vpack.c.bf16 %v740_v35, %v739_v61  ;;  %v3715_v61 = vld [vmem:[#allocation11_spill] sm:$0xff] }
 0x141   :  { %775 = vmatmul.mubr.bf16.vlgmr.msra.gmra.mxu0 %v741_v51  ;;  %818 = vmatmul.mubr.bf16.vlgmr.msra.gmra.mxu1 %v741_v51 }
 0x142   :  { %886 = vmatpush1.bf16.msra.mxu0 %v2630_v10  ;;  %929 = vmatpush1.bf16.msra.mxu1 %v2673_v18 }
 0x143   :  { %887 = vmatprep.subr.bf16.mxu0 %v2639_v12  ;;  %930 = vmatprep.subr.bf16.mxu1 %v2685_v20 }
 0x144   :  { %917 = vmatprep.mubr.bf16.mxu0 %v3714_v52  ;;  %960 = vmatprep.mubr.bf16.mxu1 %v3714_v52 }
 0x146   :  { %888 = vmatpush1.bf16.msra.mxu0 %v2651_v14  ;;  %931 = vmatpush1.bf16.msra.mxu1 %v2699_v22 }
 0x147   :  { %889 = vmatprep.subr.bf16.mxu0 %v2664_v16  ;;  %932 = vmatprep.subr.bf16.mxu1 %v2711_v24 }
 0x14a   :  { %890 = vmatpush1.bf16.msra.mxu0 %v2678_v19  ;;  %933 = vmatpush1.bf16.msra.mxu1 %v2727_v27 }
 0x14b   :  { %891 = vmatprep.subr.bf16.mxu0 %v2690_v21  ;;  %934 = vmatprep.subr.bf16.mxu1 %v2739_v29 }
 0x14e   :  { %892 = vmatpush1.bf16.msra.mxu0 %v2706_v23  ;;  %935 = vmatpush1.bf16.msra.mxu1 %v2754_v31 }
 0x14f   :  { %893 = vmatprep.subr.bf16.mxu0 %v2718_v25  ;;  %936 = vmatprep.subr.bf16.mxu1 %v2773_v34 }
 0x152   :  { %894 = vmatpush1.bf16.msra.mxu0 %v2734_v28  ;;  %937 = vmatpush1.bf16.msra.mxu1 %v2786_v37 }
 0x153   :  { %895 = vmatprep.subr.bf16.mxu0 %v2745_v30  ;;  %938 = vmatprep.subr.bf16.mxu1 %v2800_v39 }
 0x156   :  { %896 = vmatpush1.bf16.msra.mxu0 %v2759_v32  ;;  %939 = vmatpush1.bf16.msra.mxu1 %v2816_v41 }
 0x157   :  { %897 = vmatprep.subr.bf16.mxu0 %v2766_v33  ;;  %940 = vmatprep.subr.bf16.mxu1 %v2823_v42 }
 0x15a   :  { %898 = vmatpush1.bf16.msra.mxu0 %v2781_v36  ;;  %941 = vmatpush1.bf16.msra.mxu1 %v2833_v44 }
 0x15b   :  { %899 = vmatprep.subr.bf16.mxu0 %v2793_v38  ;;  %942 = vmatprep.subr.bf16.mxu1 %v2839_v45 }
 0x15e   :  { %900 = vmatpush1.bf16.msra.mxu0 %v2811_v40  ;;  %943 = vmatpush1.bf16.msra.mxu1 %v2850_v46 }
 0x15f   :  { %1028 = vmatprep.subr.bf16.mxu0 %v2625_v9  ;;  %1071 = vmatprep.subr.bf16.mxu1 %v2657_v15 }
 0x201   :  { %v776_v3 = vpop.f32.mrf.mxu0  ;;  %v819_v5 = vpop.f32.mrf.mxu1 }
 0x202   :  { %v828_v54 = vadd.f32 %v776_v3, %v2941_v7  ;;  %v3716_v3 = vld [vmem:[#allocation9_spill] sm:$0xff] }
 0x203   :  { %v778_v1 = vpop.f32.mrf.mxu0  ;;  %v821_v63 = vpop.f32.mrf.mxu1 }
 0x204   :  { %v2055_v49 = vmul.f32 -1.442695, %v828_v54  ;;  %v829_v43 = vadd.f32 %v778_v1, %v2946_v17  ;;  %v831_v7 = vadd.f32 %v821_v63, %v2972_v13  ;;  %v830_v17 = vadd.f32 %v819_v5, %v2966_v50 }
 0x205   :  { %v780_v48 = vpop.f32.mrf.mxu0  ;;  %v823_v15 = vpop.f32.mrf.mxu1 }
 0x206   :  { %2282 = vpow2.f32 %v2055_v49  ;;  %v2057_v0 = vmul.f32 -1.442695, %v829_v43  ;;  %v832_v6 = vadd.f32 %v780_v48, %v2951_v47  ;;  %v2059_v26 = vmul.f32 -1.442695, %v831_v7 }
 0x207   :  { %v782_v11 = vpop.f32.mrf.mxu0  ;;  %v825_v59 = vpop.f32.mrf.mxu1  ;;  %v834_v47 = vadd.f32 %v823_v15, %v3716_v3 }
 0x208   :  { %2284 = vpow2.f32 %v2057_v0  ;;  %v2056_v58 = vmul.f32 -1.442695, %v832_v6  ;;  %v833_v9 = vadd.f32 %v782_v11, %v2958_v57  ;;  %v835_v35 = vadd.f32 %v825_v59, %v3715_v61 }
 0x20a   :  { %2286 = vpow2.f32 %v2056_v58  ;;  %v2058_v60 = vmul.f32 -1.442695, %v833_v9  ;;  %v2060_v57 = vmul.f32 -1.442695, %v835_v35 }
 0x20c   :  { %2288 = vpow2.f32 %v2058_v60 }
 0x20d   :  { %2290 = vtanh.f32 %v830_v17 }
 0x20e   :  { %2292 = vpow2.f32 %v2059_v26 }
 0x213   :  { %v2283_v51 = vpop.eup %2282 }
 0x214   :  { %v842_v54 = vadd.f32 1.0, %v2283_v51 }
 0x215   :  { %v2285_v1 = vpop.eup %2284 }
 0x216   :  { %2294 = vrcp.f32 %v842_v54  ;;  %v854_v49 = vadd.f32 1.0, %v2285_v1 }
 0x217   :  { %v2287_v43 = vpop.eup %2286  ;;  %2296 = vtanh.f32 %v834_v47 }
 0x218   :  { %2298 = vrcp.f32 %v854_v49  ;;  %v843_v13 = vadd.f32 1.0, %v2287_v43 }
 0x219   :  { %v2289_v48 = vpop.eup %2288  ;;  %2300 = vpow2.f32 %v2060_v57 }
 0x21a   :  { %2302 = vrcp.f32 %v843_v13  ;;  %v855_v50 = vadd.f32 1.0, %v2289_v48  ;;  %v2291_v5 = vpop.eup %2290  ;;  %v3724_v48 = vld [vmem:[#allocation17_spill] sm:$0xff] }
 0x21b   :  { %v2293_v0 = vpop.eup %2292 }
 0x21c   :  { %2304 = vrcp.f32 %v855_v50  ;;  %v868_v7 = vadd.f32 1.0, %v2293_v0 }
 0x21e   :  { %2306 = vrcp.f32 %v868_v7 }
 0x223   :  { %v2295_v63 = vpop.eup %2294 }
 0x224   :  { %v2297_v6 = vpop.eup %2296  ;;  %v876_v11 = vmul.f32 %v2295_v63, %v2291_v5 }
 0x225   :  { %v2299_v58 = vpop.eup %2298 }
 0x226   :  { %v2301_v9 = vpop.eup %2300  ;;  %v874_v15 = vmul.f32 %v2299_v58, %v3122_v2 }
 0x227   :  { %v2303_v60 = vpop.eup %2302  ;;  %v869_v61 = vadd.f32 1.0, %v2301_v9 }
 0x228   :  { %v3171_v59 = vadd.f32 %v876_v11, %v874_v15  ;;  %v877_v17 = vmul.f32 %v2303_v60, %v2297_v6 }
 0x229   :  { %v2305_v26 = vpop.eup %2304 }
 0x22a   :  { %v875_v35 = vmul.f32 %v2305_v26, %v3125_v56  ;;  %2308 = vtanh.f32 %v3171_v59  ;;  %v3723_v56 = vld [vmem:[#allocation19_spill] sm:$0xff] }
 0x22b   :  { %2310 = vrcp.f32 %v869_v61  ;;  %v2307_v3 = vpop.eup %2306 }
 0x22c   :  { %v3174_v51 = vadd.f32 %v877_v17, %v875_v35 }
 0x22e   :  { %2312 = vtanh.f32 %v3174_v51 }
 0x237   :  { %v2309_v47 = vpop.eup %2308 }
 0x238   :  { %v2311_v2 = vpop.eup %2310  ;;  %v882_v1 = vmul.f32 %v2309_v47, %v2307_v3 }
 0x23b   :  { %v2313_v54 = vpop.eup %2312 }
 0x23c   :  { %v883_v57 = vmul.f32 %v2313_v54, %v2311_v2 }
 0x23e   :  { %v884_v49 = vpack.c.bf16 %v883_v57, %v882_v1 }
 0x240   :  { %918 = vmatmul.mubr.bf16.vlgmr.msra.gmra.mxu0 %v884_v49  ;;  %961 = vmatmul.mubr.bf16.vlgmr.msra.gmra.mxu1 %v884_v49 }
 0x241   :  { %1029 = vmatpush1.bf16.msra.mxu0 %v2630_v10  ;;  %1072 = vmatpush1.bf16.msra.mxu1 %v2673_v18  ;;  %v3213_v10 = vld [vmem:[%s3659_s2 + $0xe4] ss:$16 sps:$4 sm:$0xff]  }
 0x242   :  { %1030 = vmatprep.subr.bf16.mxu0 %v2639_v12  ;;  %1073 = vmatprep.subr.bf16.mxu1 %v2685_v20  ;;  %v3219_v12 = vld [vmem:[%s3659_s2 + $0xec] ss:$16 sps:$4 sm:$0xff]  }
 0x243   :  { %1060 = vmatprep.mubr.bf16.mxu0 %v3714_v52  ;;  %1103 = vmatprep.mubr.bf16.mxu1 %v3714_v52 }
 0x245   :  { %1031 = vmatpush1.bf16.msra.mxu0 %v2651_v14  ;;  %1074 = vmatpush1.bf16.msra.mxu1 %v2699_v22  ;;  %v3718_v22 = vld [vmem:[#allocation7_spill] sm:$0xff] }
 0x246   :  { %1032 = vmatprep.subr.bf16.mxu0 %v2664_v16  ;;  %1075 = vmatprep.subr.bf16.mxu1 %v2711_v24  ;;  %v3717_v16 = vld [vmem:[#allocation6_spill] sm:$0xff] }
 0x249   :  { %1033 = vmatpush1.bf16.msra.mxu0 %v2678_v19  ;;  %1076 = vmatpush1.bf16.msra.mxu1 %v2727_v27 }
 0x24a   :  { %1034 = vmatprep.subr.bf16.mxu0 %v2690_v21  ;;  %1077 = vmatprep.subr.bf16.mxu1 %v2739_v29 }
 0x24d   :  { %1035 = vmatpush1.bf16.msra.mxu0 %v2706_v23  ;;  %1078 = vmatpush1.bf16.msra.mxu1 %v2754_v31 }
 0x24e   :  { %1036 = vmatprep.subr.bf16.mxu0 %v2718_v25  ;;  %1079 = vmatprep.subr.bf16.mxu1 %v2773_v34 }
 0x251   :  { %1037 = vmatpush1.bf16.msra.mxu0 %v2734_v28  ;;  %1080 = vmatpush1.bf16.msra.mxu1 %v2786_v37  ;;  %v3719_v28 = vld [vmem:[#allocation8_spill] sm:$0xff]  ;;  %v3721_v37 = vld [vmem:[#allocation15_spill] sm:$0xff] }
 0x252   :  { %1038 = vmatprep.subr.bf16.mxu0 %v2745_v30  ;;  %1081 = vmatprep.subr.bf16.mxu1 %v2800_v39 }
 0x255   :  { %1039 = vmatpush1.bf16.msra.mxu0 %v2759_v32  ;;  %1082 = vmatpush1.bf16.msra.mxu1 %v2816_v41  ;;  %v3720_v32 = vld [vmem:[#allocation10_spill] sm:$0xff] }
 0x256   :  { %1040 = vmatprep.subr.bf16.mxu0 %v2766_v33  ;;  %1083 = vmatprep.subr.bf16.mxu1 %v2823_v42 }
 0x259   :  { %1041 = vmatpush1.bf16.msra.mxu0 %v2781_v36  ;;  %1084 = vmatpush1.bf16.msra.mxu1 %v2833_v44 }
 0x25a   :  { %1042 = vmatprep.subr.bf16.mxu0 %v2793_v38  ;;  %1085 = vmatprep.subr.bf16.mxu1 %v2839_v45 }
 0x25d   :  { %1043 = vmatpush1.bf16.msra.mxu0 %v2811_v40  ;;  %1086 = vmatpush1.bf16.msra.mxu1 %v2850_v46  ;;  %v3722_v40 = vld [vmem:[#allocation13_spill] sm:$0xff] }
 0x25e   :  { %1171 = vmatprep.subr.bf16.mxu0 %v3213_v10  ;;  %1214 = vmatprep.subr.bf16.mxu1 %v3219_v12 }
 0x300   :  { %v919_v14 = vpop.f32.mrf.mxu0  ;;  %v962_v19 = vpop.f32.mrf.mxu1 }
 0x301   :  { %v971_v18 = vadd.f32 %v919_v14, %v3717_v16  ;;  %v973_v41 = vadd.f32 %v962_v19, %v3722_v40  ;;  %v3327_v40 = vld [vmem:[%s3659_s2 + $0x64] ss:$16 sps:$4 sm:$0xff]  }
 0x302   :  { %v921_v20 = vpop.f32.mrf.mxu0  ;;  %v964_v27 = vpop.f32.mrf.mxu1 }
 0x303   :  { %v2061_v21 = vmul.f32 -1.442695, %v971_v18  ;;  %v972_v23 = vadd.f32 %v921_v20, %v3718_v22  ;;  %v974_v38 = vadd.f32 %v964_v27, %v3721_v37  ;;  %v3253_v27 = vld [vmem:[%s3659_s2 + $0xc4] ss:$16 sps:$4 sm:$0xff]   ;;  %v3309_v37 = vld [vmem:[%s3659_s2 + $0x8c] ss:$16 sps:$4 sm:$0xff]  }
 0x304   :  { %v923_v24 = vpop.f32.mrf.mxu0  ;;  %v966_v34 = vpop.f32.mrf.mxu1 }
 0x305   :  { %2314 = vpow2.f32 %v2061_v21  ;;  %v2063_v25 = vmul.f32 -1.442695, %v972_v23  ;;  %v975_v29 = vadd.f32 %v923_v24, %v3719_v28  ;;  %v2065_v42 = vmul.f32 -1.442695, %v974_v38  ;;  %v3259_v28 = vld [vmem:[%s3659_s2 + $0xcc] ss:$16 sps:$4 sm:$0xff]  }
 0x306   :  { %v925_v30 = vpop.f32.mrf.mxu0  ;;  %v968_v39 = vpop.f32.mrf.mxu1  ;;  %v977_v50 = vadd.f32 %v966_v34, %v3724_v48  ;;  %v3297_v34 = vld [vmem:[%s3659_s2 + $0xa8] ss:$16 sps:$4 sm:$0xff]   ;;  %v3315_v38 = vld [vmem:[%s3659_s2 + $0x80] ss:$16 sps:$4 sm:$0xff]  }
 0x307   :  { %2316 = vpow2.f32 %v2063_v25  ;;  %v2062_v31 = vmul.f32 -1.442695, %v975_v29  ;;  %v976_v33 = vadd.f32 %v925_v30, %v3720_v32  ;;  %v978_v43 = vadd.f32 %v968_v39, %v3723_v56  ;;  %v3247_v25 = vld [vmem:[%s3659_s2 + $0xe8] ss:$16 sps:$4 sm:$0xff]   ;;  %v3267_v29 = vld [vmem:[%s3659_s2 + $0xc0] ss:$16 sps:$4 sm:$0xff]  }
 0x308   :  { %v3273_v30 = vld [vmem:[%s3659_s2 + $0xc8] ss:$16 sps:$4 sm:$0xff]   ;;  %v3285_v32 = vld [vmem:[%s3659_s2 + $0xac] ss:$16 sps:$4 sm:$0xff]   ;;  %v3363_v48 = vld [vmem:[%s3659_s2 + $0x40] ss:$16 sps:$4 sm:$0xff]  }
 0x309   :  { %2318 = vpow2.f32 %v2062_v31  ;;  %v2064_v36 = vmul.f32 -1.442695, %v976_v33  ;;  %v2066_v63 = vmul.f32 -1.442695, %v978_v43  ;;  %v3279_v31 = vld [vmem:[%s3659_s2 + $0xa4] ss:$16 sps:$4 sm:$0xff]  }
 0x30a   :  { %v3291_v33 = vld [vmem:[%s3659_s2 + $0xa0] ss:$16 sps:$4 sm:$0xff]   ;;  %v3321_v39 = vld [vmem:[%s3659_s2 + $0x88] ss:$16 sps:$4 sm:$0xff]   ;;  %v3351_v43 = vld [vmem:[%s3659_s2 + $0x44] ss:$16 sps:$4 sm:$0xff]  }
 0x30b   :  { %2320 = vpow2.f32 %v2064_v36  ;;  %v3303_v36 = vld [vmem:[%s3659_s2 + $0x84] ss:$16 sps:$4 sm:$0xff]   ;;  %v3345_v56 = vld [vmem:[%s3659_s2 + $0x68] ss:$16 sps:$4 sm:$0xff]  }
 0x30c   :  { %2322 = vtanh.f32 %v973_v41  ;;  %v3333_v41 = vld [vmem:[%s3659_s2 + $0x6c] ss:$16 sps:$4 sm:$0xff]  }
 0x30d   :  { %2324 = vpow2.f32 %v2065_v42  ;;  %v3339_v42 = vld [vmem:[%s3659_s2 + $0x60] ss:$16 sps:$4 sm:$0xff]  }
 0x312   :  { %v2315_v13 = vpop.eup %2314 }
 0x313   :  { %v985_v5 = vadd.f32 1.0, %v2315_v13  ;;  %v3357_v13 = vld [vmem:[%s3659_s2 + $0x4c] ss:$16 sps:$4 sm:$0xff]  }
 0x314   :  { %v2317_v0 = vpop.eup %2316 }
 0x315   :  { %2326 = vrcp.f32 %v985_v5  ;;  %v997_v6 = vadd.f32 1.0, %v2317_v0  ;;  %v3375_v5 = vld [vmem:[%s3659_s2 + $0x24] ss:$16 sps:$4 sm:$0xff]   ;;  %v3381_v0 = vld [vmem:[%s3659_s2 + $0x2c] ss:$16 sps:$4 sm:$0xff]  }
 0x316   :  { %v2319_v11 = vpop.eup %2318  ;;  %2328 = vtanh.f32 %v977_v50  ;;  %v3369_v50 = vld [vmem:[%s3659_s2 + $0x48] ss:$16 sps:$4 sm:$0xff]  }
 0x317   :  { %2330 = vrcp.f32 %v997_v6  ;;  %v986_v58 = vadd.f32 1.0, %v2319_v11  ;;  %v3394_v6 = vld [vmem:[%s3659_s2 + $0x4] ss:$16 sps:$4 sm:$0xff]   ;;  %v3401_v11 = vld [vmem:[%s3659_s2] ss:$16 sps:$4 sm:$0xff]  }
 0x318   :  { %v2321_v9 = vpop.eup %2320  ;;  %2332 = vpow2.f32 %v2066_v63  ;;  %v3387_v63 = vld [vmem:[%s3659_s2 + $0x20] ss:$16 sps:$4 sm:$0xff]  }
 0x319   :  { %2334 = vrcp.f32 %v986_v58  ;;  %v998_v15 = vadd.f32 1.0, %v2321_v9  ;;  %v2323_v60 = vpop.eup %2322  ;;  %v3725_v58 = vld [vmem:[#allocation12_spill] sm:$0xff] }
 0x31a   :  { %v2325_v7 = vpop.eup %2324 }
 0x31b   :  { %2336 = vrcp.f32 %v998_v15  ;;  %v1011_v54 = vadd.f32 1.0, %v2325_v7 }
 0x31d   :  { %2338 = vrcp.f32 %v1011_v54  ;;  %v3728_v54 = vld [vmem:[#allocation18_spill] sm:$0xff] }
 0x322   :  { %v2327_v17 = vpop.eup %2326 }
 0x323   :  { %v2329_v26 = vpop.eup %2328  ;;  %v1019_v61 = vmul.f32 %v2327_v17, %v2323_v60 }
 0x324   :  { %v2331_v35 = vpop.eup %2330 }
 0x325   :  { %v2333_v3 = vpop.eup %2332  ;;  %v1017_v47 = vmul.f32 %v2331_v35, %v3171_v59 }
 0x326   :  { %v2335_v2 = vpop.eup %2334  ;;  %v1012_v14 = vadd.f32 1.0, %v2333_v3  ;;  %v3727_v3 = vld [vmem:[#allocation16_spill] sm:$0xff] }
 0x327   :  { %v3231_v1 = vadd.f32 %v1019_v61, %v1017_v47  ;;  %v1020_v57 = vmul.f32 %v2335_v2, %v2329_v26 }
 0x328   :  { %v2337_v49 = vpop.eup %2336 }
 0x329   :  { %v1018_v16 = vmul.f32 %v2337_v49, %v3174_v51  ;;  %2340 = vtanh.f32 %v3231_v1  ;;  %v3241_v51 = vld [vmem:[%s3659_s2 + $0xe0] ss:$16 sps:$4 sm:$0xff]  }
 0x32a   :  { %2342 = vrcp.f32 %v1012_v14  ;;  %v2339_v19 = vpop.eup %2338 }
 0x32b   :  { %v3234_v18 = vadd.f32 %v1020_v57, %v1018_v16  ;;  %v3729_v16 = vld [vmem:[#allocation23_spill] sm:$0xff] }
 0x32d   :  { %2344 = vtanh.f32 %v3234_v18 }
 0x336   :  { %v2341_v20 = vpop.eup %2340 }
 0x337   :  { %v2343_v59 = vpop.eup %2342  ;;  %v1025_v22 = vmul.f32 %v2341_v20, %v2339_v19 }
 0x33a   :  { %v2345_v21 = vpop.eup %2344 }
 0x33b   :  { %v1026_v23 = vmul.f32 %v2345_v21, %v2343_v59  ;;  %v3730_v59 = vld [vmem:[#allocation21_spill] sm:$0xff] }
 0x33d   :  { %v1027_v24 = vpack.c.bf16 %v1026_v23, %v1025_v22  ;;  %v3731_v23 = vld [vmem:[#allocation27_spill] sm:$0xff] }
 0x33f   :  { %1061 = vmatmul.mubr.bf16.vlgmr.msra.gmra.mxu0 %v1027_v24  ;;  %1104 = vmatmul.mubr.bf16.vlgmr.msra.gmra.mxu1 %v1027_v24 }
 0x340   :  { %1172 = vmatpush1.bf16.msra.mxu0 %v3241_v51  ;;  %1215 = vmatpush1.bf16.msra.mxu1 %v3247_v25 }
 0x341   :  { %1173 = vmatprep.subr.bf16.mxu0 %v3253_v27  ;;  %1216 = vmatprep.subr.bf16.mxu1 %v3259_v28 }
 0x342   :  { %1203 = vmatprep.mubr.bf16.mxu0 %v3714_v52  ;;  %1246 = vmatprep.mubr.bf16.mxu1 %v3714_v52 }
 0x344   :  { %1174 = vmatpush1.bf16.msra.mxu0 %v3267_v29  ;;  %1217 = vmatpush1.bf16.msra.mxu1 %v3273_v30 }
 0x345   :  { %1175 = vmatprep.subr.bf16.mxu0 %v3279_v31  ;;  %1218 = vmatprep.subr.bf16.mxu1 %v3285_v32 }
 0x348   :  { %1176 = vmatpush1.bf16.msra.mxu0 %v3291_v33  ;;  %1219 = vmatpush1.bf16.msra.mxu1 %v3297_v34 }
 0x349   :  { %1177 = vmatprep.subr.bf16.mxu0 %v3303_v36  ;;  %1220 = vmatprep.subr.bf16.mxu1 %v3309_v37 }
 0x34c   :  { %1178 = vmatpush1.bf16.msra.mxu0 %v3315_v38  ;;  %1221 = vmatpush1.bf16.msra.mxu1 %v3321_v39 }
 0x34d   :  { %1179 = vmatprep.subr.bf16.mxu0 %v3327_v40  ;;  %1222 = vmatprep.subr.bf16.mxu1 %v3333_v41 }
 0x350   :  { %1180 = vmatpush1.bf16.msra.mxu0 %v3339_v42  ;;  %1223 = vmatpush1.bf16.msra.mxu1 %v3345_v56 }
 0x351   :  { %1181 = vmatprep.subr.bf16.mxu0 %v3351_v43  ;;  %1224 = vmatprep.subr.bf16.mxu1 %v3357_v13 }
 0x354   :  { %1182 = vmatpush1.bf16.msra.mxu0 %v3363_v48  ;;  %1225 = vmatpush1.bf16.msra.mxu1 %v3369_v50 }
 0x355   :  { %1183 = vmatprep.subr.bf16.mxu0 %v3375_v5  ;;  %1226 = vmatprep.subr.bf16.mxu1 %v3381_v0 }
 0x358   :  { %1184 = vmatpush1.bf16.msra.mxu0 %v3387_v63  ;;  %1227 = vmatpush1.bf16.msra.mxu1 %v2833_v44 }
 0x359   :  { %1185 = vmatprep.subr.bf16.mxu0 %v3394_v6  ;;  %1228 = vmatprep.subr.bf16.mxu1 %v2839_v45  ;;  %v3726_v45 = vld [vmem:[#allocation14_spill] sm:$0xff] }
 0x35c   :  { %1186 = vmatpush1.bf16.msra.mxu0 %v3401_v11  ;;  %1229 = vmatpush1.bf16.msra.mxu1 %v2850_v46 }
 0x35d   :  { %1314 = vmatprep.subr.bf16.mxu0 %v3213_v10  ;;  %1357 = vmatprep.subr.bf16.mxu1 %v3219_v12 }
 0x3ff   :  { %v1062_v44 = vpop.f32.mrf.mxu0  ;;  %v1105_v15 = vpop.f32.mrf.mxu1 }
 0x400   :  { %v1114_v9 = vadd.f32 %v1062_v44, %v3725_v58  ;;  %v1116_v21 = vadd.f32 %v1105_v15, %v3730_v59  ;;  %v3732_v58 = vld [vmem:[#allocation25_spill] sm:$0xff] }
 0x401   :  { %v1064_v60 = vpop.f32.mrf.mxu0  ;;  %v1107_v35 = vpop.f32.mrf.mxu1 }
 0x402   :  { %v2067_v7 = vmul.f32 -1.442695, %v1114_v9  ;;  %v1115_v17 = vadd.f32 %v1064_v60, %v3726_v45  ;;  %v1117_v19 = vadd.f32 %v1107_v35, %v3729_v16 }
 0x403   :  { %v1066_v26 = vpop.f32.mrf.mxu0  ;;  %v1109_v49 = vpop.f32.mrf.mxu1 }
 0x404   :  { %2346 = vpow2.f32 %v2067_v7  ;;  %v2069_v61 = vmul.f32 -1.442695, %v1115_v17  ;;  %v1118_v47 = vadd.f32 %v1066_v26, %v3727_v3  ;;  %v2071_v22 = vmul.f32 -1.442695, %v1117_v19 }
 0x405   :  { %v1068_v2 = vpop.f32.mrf.mxu0  ;;  %v1111_v20 = vpop.f32.mrf.mxu1  ;;  %v1120_v9 = vadd.f32 %v1109_v49, %v3732_v58 }
 0x406   :  { %2348 = vpow2.f32 %v2069_v61  ;;  %v2068_v46 = vmul.f32 -1.442695, %v1118_v47  ;;  %v1119_v57 = vadd.f32 %v1068_v2, %v3728_v54  ;;  %v1121_v24 = vadd.f32 %v1111_v20, %v3731_v23 }
 0x408   :  { %2350 = vpow2.f32 %v2068_v46  ;;  %v2070_v14 = vmul.f32 -1.442695, %v1119_v57  ;;  %v2072_v45 = vmul.f32 -1.442695, %v1121_v24 }
 0x40a   :  { %2352 = vpow2.f32 %v2070_v14 }
 0x40b   :  { %2354 = vtanh.f32 %v1116_v21 }
 0x40c   :  { %2356 = vpow2.f32 %v2071_v22 }
 0x411   :  { %v2347_v44 = vpop.eup %2346 }
 0x412   :  { %v1128_v60 = vadd.f32 1.0, %v2347_v44 }
 0x413   :  { %v2349_v7 = vpop.eup %2348 }
 0x414   :  { %2358 = vrcp.f32 %v1128_v60  ;;  %v1140_v17 = vadd.f32 1.0, %v2349_v7 }
 0x415   :  { %v2351_v26 = vpop.eup %2350  ;;  %2360 = vtanh.f32 %v1120_v9 }
 0x416   :  { %2362 = vrcp.f32 %v1140_v17  ;;  %v1129_v61 = vadd.f32 1.0, %v2351_v26  ;;  %v3460_v17 = vld [vmem:[%s3659_s2 + $0xc] ss:$16 sps:$4 sm:$0xff]   ;;  %v3467_v26 = vld [vmem:[%s3659_s2 + $0x8] ss:$16 sps:$4 sm:$0xff]  }
 0x417   :  { %v2353_v35 = vpop.eup %2352  ;;  %2364 = vpow2.f32 %v2072_v45 }
 0x418   :  { %2366 = vrcp.f32 %v1129_v61  ;;  %v1141_v15 = vadd.f32 1.0, %v2353_v35  ;;  %v2355_v3 = vpop.eup %2354  ;;  %v3733_v35 = vld [vmem:[#allocation20_spill] sm:$0xff] }
 0x419   :  { %v2357_v47 = vpop.eup %2356 }
 0x41a   :  { %2368 = vrcp.f32 %v1141_v15  ;;  %v1154_v19 = vadd.f32 1.0, %v2357_v47 }
 0x41c   :  { %2370 = vrcp.f32 %v1154_v19 }
 0x421   :  { %v2359_v2 = vpop.eup %2358 }
 0x422   :  { %v2361_v46 = vpop.eup %2360  ;;  %v1162_v54 = vmul.f32 %v2359_v2, %v2355_v3 }
 0x423   :  { %v2363_v57 = vpop.eup %2362 }
 0x424   :  { %v2365_v49 = vpop.eup %2364  ;;  %v1160_v14 = vmul.f32 %v2363_v57, %v3231_v1 }
 0x425   :  { %v2367_v16 = vpop.eup %2366  ;;  %v1155_v22 = vadd.f32 1.0, %v2365_v49 }
 0x426   :  { %v3416_v20 = vadd.f32 %v1162_v54, %v1160_v14  ;;  %v1163_v59 = vmul.f32 %v2367_v16, %v2361_v46  ;;  %v3734_v46 = vld [vmem:[#allocation22_spill] sm:$0xff]  ;;  %v3735_v16 = vld [vmem:[#allocation24_spill] sm:$0xff] }
 0x427   :  { %v2369_v21 = vpop.eup %2368 }
 0x428   :  { %v1161_v23 = vmul.f32 %v2369_v21, %v3234_v18  ;;  %2372 = vtanh.f32 %v3416_v20  ;;  %v3453_v18 = vld [vmem:[%s3659_s2 + $0x28] ss:$16 sps:$4 sm:$0xff]  }
 0x429   :  { %2374 = vrcp.f32 %v1155_v22  ;;  %v2371_v44 = vpop.eup %2370  ;;  %v3736_v22 = vld [vmem:[#allocation26_spill] sm:$0xff] }
 0x42a   :  { %v3419_v24 = vadd.f32 %v1163_v59, %v1161_v23 }
 0x42c   :  { %2376 = vtanh.f32 %v3419_v24 }
 0x435   :  { %v2373_v58 = vpop.eup %2372 }
 0x436   :  { %v2375_v1 = vpop.eup %2374  ;;  %v1168_v60 = vmul.f32 %v2373_v58, %v2371_v44 }
 0x439   :  { %v2377_v9 = vpop.eup %2376 }
 0x43a   :  { %v1169_v7 = vmul.f32 %v2377_v9, %v2375_v1  ;;  %v3737_v1 = vld [vmem:[#allocation31_spill] sm:$0xff] }
 0x43c   :  { %v1170_v45 = vpack.c.bf16 %v1169_v7, %v1168_v60  ;;  %v3738_v7 = vld [vmem:[#allocation29_spill] sm:$0xff] }
 0x43e   :  { %1204 = vmatmul.mubr.bf16.vlgmr.msra.gmra.mxu0 %v1170_v45  ;;  %1247 = vmatmul.mubr.bf16.vlgmr.msra.gmra.mxu1 %v1170_v45 }
 0x43f   :  { %1315 = vmatpush1.bf16.msra.mxu0 %v3241_v51  ;;  %1358 = vmatpush1.bf16.msra.mxu1 %v3247_v25 }
 0x440   :  { %1316 = vmatprep.subr.bf16.mxu0 %v3253_v27  ;;  %1359 = vmatprep.subr.bf16.mxu1 %v3259_v28 }
 0x441   :  { %1346 = vmatprep.mubr.bf16.mxu0 %v3714_v52  ;;  %1389 = vmatprep.mubr.bf16.mxu1 %v3714_v52 }
 0x443   :  { %1317 = vmatpush1.bf16.msra.mxu0 %v3267_v29  ;;  %1360 = vmatpush1.bf16.msra.mxu1 %v3273_v30 }
 0x444   :  { %1318 = vmatprep.subr.bf16.mxu0 %v3279_v31  ;;  %1361 = vmatprep.subr.bf16.mxu1 %v3285_v32 }
 0x447   :  { %1319 = vmatpush1.bf16.msra.mxu0 %v3291_v33  ;;  %1362 = vmatpush1.bf16.msra.mxu1 %v3297_v34 }
 0x448   :  { %1320 = vmatprep.subr.bf16.mxu0 %v3303_v36  ;;  %1363 = vmatprep.subr.bf16.mxu1 %v3309_v37 }
 0x44b   :  { %1321 = vmatpush1.bf16.msra.mxu0 %v3315_v38  ;;  %1364 = vmatpush1.bf16.msra.mxu1 %v3321_v39 }
 0x44c   :  { %1322 = vmatprep.subr.bf16.mxu0 %v3327_v40  ;;  %1365 = vmatprep.subr.bf16.mxu1 %v3333_v41 }
 0x44f   :  { %1323 = vmatpush1.bf16.msra.mxu0 %v3339_v42  ;;  %1366 = vmatpush1.bf16.msra.mxu1 %v3345_v56 }
 0x450   :  { %1324 = vmatprep.subr.bf16.mxu0 %v3351_v43  ;;  %1367 = vmatprep.subr.bf16.mxu1 %v3357_v13 }
 0x453   :  { %1325 = vmatpush1.bf16.msra.mxu0 %v3363_v48  ;;  %1368 = vmatpush1.bf16.msra.mxu1 %v3369_v50 }
 0x454   :  { %1326 = vmatprep.subr.bf16.mxu0 %v3375_v5  ;;  %1369 = vmatprep.subr.bf16.mxu1 %v3381_v0 }
 0x457   :  { %1327 = vmatpush1.bf16.msra.mxu0 %v3387_v63  ;;  %1370 = vmatpush1.bf16.msra.mxu1 %v3453_v18 }
 0x458   :  { %1328 = vmatprep.subr.bf16.mxu0 %v3394_v6  ;;  %1371 = vmatprep.subr.bf16.mxu1 %v3460_v17 }
 0x45b   :  { %1329 = vmatpush1.bf16.msra.mxu0 %v3401_v11  ;;  %1372 = vmatpush1.bf16.msra.mxu1 %v3467_v26 }
 0x45c   :  { %1457 = vmatprep.subr.bf16.mxu0 %v3213_v10  ;;  %1500 = vmatprep.subr.bf16.mxu1 %v3219_v12 }
 0x4fe   :  { %v1205_v61 = vpop.f32.mrf.mxu0  ;;  %v1248_v3 = vpop.f32.mrf.mxu1 }
 0x4ff   :  { %v1257_v15 = vadd.f32 %v1205_v61, %v3733_v35  ;;  %v1259_v45 = vadd.f32 %v1248_v3, %v3738_v7  ;;  %v3739_v35 = vld [vmem:[#allocation35_spill] sm:$0xff] }
 0x500   :  { %v1207_v47 = vpop.f32.mrf.mxu0  ;;  %v1250_v14 = vpop.f32.mrf.mxu1 }
 0x501   :  { %v2073_v2 = vmul.f32 -1.442695, %v1257_v15  ;;  %v1258_v54 = vadd.f32 %v1207_v47, %v3734_v46  ;;  %v1260_v9 = vadd.f32 %v1250_v14, %v3737_v1 }
 0x502   :  { %v1209_v57 = vpop.f32.mrf.mxu0  ;;  %v1252_v44 = vpop.f32.mrf.mxu1 }
 0x503   :  { %2378 = vpow2.f32 %v2073_v2  ;;  %v2075_v49 = vmul.f32 -1.442695, %v1258_v54  ;;  %v1261_v19 = vadd.f32 %v1209_v57, %v3735_v16  ;;  %v2077_v61 = vmul.f32 -1.442695, %v1260_v9  ;;  %v3740_v2 = vld [vmem:[#allocation33_spill] sm:$0xff] }
 0x504   :  { %v1211_v59 = vpop.f32.mrf.mxu0  ;;  %v1254_v60 = vpop.f32.mrf.mxu1  ;;  %v1263_v46 = vadd.f32 %v1252_v44, %v3740_v2 }
 0x505   :  { %2380 = vpow2.f32 %v2075_v49  ;;  %v2074_v21 = vmul.f32 -1.442695, %v1261_v19  ;;  %v1262_v23 = vadd.f32 %v1211_v59, %v3736_v22  ;;  %v1264_v15 = vadd.f32 %v1254_v60, %v3739_v35 }
 0x507   :  { %2382 = vpow2.f32 %v2074_v21  ;;  %v2076_v58 = vmul.f32 -1.442695, %v1262_v23  ;;  %v2078_v49 = vmul.f32 -1.442695, %v1264_v15 }
 0x509   :  { %2384 = vpow2.f32 %v2076_v58 }
 0x50a   :  { %2386 = vtanh.f32 %v1259_v45 }
 0x50b   :  { %2388 = vpow2.f32 %v2077_v61 }
 0x510   :  { %v2379_v47 = vpop.eup %2378 }
 0x511   :  { %v1271_v54 = vadd.f32 1.0, %v2379_v47 }
 0x512   :  { %v2381_v57 = vpop.eup %2380 }
 0x513   :  { %2390 = vrcp.f32 %v1271_v54  ;;  %v1283_v16 = vadd.f32 1.0, %v2381_v57 }
 0x514   :  { %v2383_v19 = vpop.eup %2382  ;;  %2392 = vtanh.f32 %v1263_v46 }
 0x515   :  { %2394 = vrcp.f32 %v1283_v16  ;;  %v1272_v14 = vadd.f32 1.0, %v2383_v19 }
 0x516   :  { %v2385_v59 = vpop.eup %2384  ;;  %2396 = vpow2.f32 %v2078_v49 }
 0x517   :  { %2398 = vrcp.f32 %v1272_v14  ;;  %v1284_v3 = vadd.f32 1.0, %v2385_v59  ;;  %v2387_v21 = vpop.eup %2386  ;;  %v3741_v59 = vld [vmem:[#allocation28_spill] sm:$0xff] }
 0x518   :  { %v2389_v22 = vpop.eup %2388 }
 0x519   :  { %2400 = vrcp.f32 %v1284_v3  ;;  %v1297_v45 = vadd.f32 1.0, %v2389_v22 }
 0x51b   :  { %2402 = vrcp.f32 %v1297_v45 }
 0x520   :  { %v2391_v23 = vpop.eup %2390 }
 0x521   :  { %v2393_v44 = vpop.eup %2392  ;;  %v1305_v58 = vmul.f32 %v2391_v23, %v2387_v21 }
 0x522   :  { %v2395_v1 = vpop.eup %2394 }
 0x523   :  { %v2397_v9 = vpop.eup %2396  ;;  %v1303_v60 = vmul.f32 %v2395_v1, %v3416_v20 }
 0x524   :  { %v2399_v7 = vpop.eup %2398  ;;  %v1298_v47 = vadd.f32 1.0, %v2397_v9 }
 0x525   :  { %v3481_v61 = vadd.f32 %v1305_v58, %v1303_v60  ;;  %v1306_v35 = vmul.f32 %v2399_v7, %v2393_v44  ;;  %v3742_v44 = vld [vmem:[#allocation30_spill] sm:$0xff]  ;;  %v3743_v7 = vld [vmem:[#allocation32_spill] sm:$0xff] }
 0x526   :  { %v2401_v15 = vpop.eup %2400 }
 0x527   :  { %v1304_v2 = vmul.f32 %v2401_v15, %v3419_v24  ;;  %2404 = vtanh.f32 %v3481_v61 }
 0x528   :  { %2406 = vrcp.f32 %v1298_v47  ;;  %v2403_v54 = vpop.eup %2402 }
 0x529   :  { %v3484_v46 = vadd.f32 %v1306_v35, %v1304_v2 }
 0x52b   :  { %2408 = vtanh.f32 %v3484_v46 }
 0x534   :  { %v2405_v57 = vpop.eup %2404 }
 0x535   :  { %v2407_v20 = vpop.eup %2406  ;;  %v1311_v16 = vmul.f32 %v2405_v57, %v2403_v54  ;;  %v3745_v54 = vld [vmem:[#allocation39_spill] sm:$0xff] }
 0x538   :  { %v2409_v49 = vpop.eup %2408 }
 0x539   :  { %v1312_v19 = vmul.f32 %v2409_v49, %v2407_v20  ;;  %v3746_v49 = vld [vmem:[#allocation37_spill] sm:$0xff] }
 0x53b   :  { %v1313_v14 = vpack.c.bf16 %v1312_v19, %v1311_v16 }
 0x53d   :  { %1347 = vmatmul.mubr.bf16.vlgmr.msra.gmra.mxu0 %v1313_v14  ;;  %1390 = vmatmul.mubr.bf16.vlgmr.msra.gmra.mxu1 %v1313_v14  ;;  %v3747_v14 = vld [vmem:[#allocation43_spill] sm:$0xff] }
 0x53e   :  { %1458 = vmatpush1.bf16.msra.mxu0 %v3241_v51  ;;  %1501 = vmatpush1.bf16.msra.mxu1 %v3247_v25 }
 0x53f   :  { %1459 = vmatprep.subr.bf16.mxu0 %v3253_v27  ;;  %1502 = vmatprep.subr.bf16.mxu1 %v3259_v28 }
 0x540   :  { %1489 = vmatprep.mubr.bf16.mxu0 %v3714_v52  ;;  %1532 = vmatprep.mubr.bf16.mxu1 %v3714_v52 }
 0x542   :  { %1460 = vmatpush1.bf16.msra.mxu0 %v3267_v29  ;;  %1503 = vmatpush1.bf16.msra.mxu1 %v3273_v30 }
 0x543   :  { %1461 = vmatprep.subr.bf16.mxu0 %v3279_v31  ;;  %1504 = vmatprep.subr.bf16.mxu1 %v3285_v32 }
 0x546   :  { %1462 = vmatpush1.bf16.msra.mxu0 %v3291_v33  ;;  %1505 = vmatpush1.bf16.msra.mxu1 %v3297_v34 }
 0x547   :  { %1463 = vmatprep.subr.bf16.mxu0 %v3303_v36  ;;  %1506 = vmatprep.subr.bf16.mxu1 %v3309_v37 }
 0x54a   :  { %1464 = vmatpush1.bf16.msra.mxu0 %v3315_v38  ;;  %1507 = vmatpush1.bf16.msra.mxu1 %v3321_v39 }
 0x54b   :  { %1465 = vmatprep.subr.bf16.mxu0 %v3327_v40  ;;  %1508 = vmatprep.subr.bf16.mxu1 %v3333_v41 }
 0x54e   :  { %1466 = vmatpush1.bf16.msra.mxu0 %v3339_v42  ;;  %1509 = vmatpush1.bf16.msra.mxu1 %v3345_v56 }
 0x54f   :  { %1467 = vmatprep.subr.bf16.mxu0 %v3351_v43  ;;  %1510 = vmatprep.subr.bf16.mxu1 %v3357_v13 }
 0x552   :  { %1468 = vmatpush1.bf16.msra.mxu0 %v3363_v48  ;;  %1511 = vmatpush1.bf16.msra.mxu1 %v3369_v50 }
 0x553   :  { %1469 = vmatprep.subr.bf16.mxu0 %v3375_v5  ;;  %1512 = vmatprep.subr.bf16.mxu1 %v3381_v0 }
 0x556   :  { %1470 = vmatpush1.bf16.msra.mxu0 %v3387_v63  ;;  %1513 = vmatpush1.bf16.msra.mxu1 %v3453_v18 }
 0x557   :  { %1471 = vmatprep.subr.bf16.mxu0 %v3394_v6  ;;  %1514 = vmatprep.subr.bf16.mxu1 %v3460_v17 }
 0x55a   :  { %1472 = vmatpush1.bf16.msra.mxu0 %v3401_v11  ;;  %1515 = vmatpush1.bf16.msra.mxu1 %v3467_v26 }
 0x55b   :  { %1600 = vmatprep.subr.bf16.mxu0 %v3213_v10  ;;  %1643 = vmatprep.subr.bf16.mxu1 %v3219_v12  ;;  %v3744_v10 = vld [vmem:[#allocation34_spill] sm:$0xff] }
 0x5fd   :  { %v1348_v24 = vpop.f32.mrf.mxu0  ;;  %v1391_v21 = vpop.f32.mrf.mxu1 }
 0x5fe   :  { %v1400_v3 = vadd.f32 %v1348_v24, %v3741_v59  ;;  %v1402_v16 = vadd.f32 %v1391_v21, %v3746_v49 }
 0x5ff   :  { %v1350_v22 = vpop.f32.mrf.mxu0  ;;  %v1393_v60 = vpop.f32.mrf.mxu1 }
 0x600   :  { %v2079_v23 = vmul.f32 -1.442695, %v1400_v3  ;;  %v1401_v58 = vadd.f32 %v1350_v22, %v3742_v44  ;;  %v1403_v57 = vadd.f32 %v1393_v60, %v3745_v54  ;;  %v3748_v3 = vld [vmem:[#allocation41_spill] sm:$0xff] }
 0x601   :  { %v1352_v1 = vpop.f32.mrf.mxu0  ;;  %v1395_v12 = vpop.f32.mrf.mxu1 }
 0x602   :  { %2410 = vpow2.f32 %v2079_v23  ;;  %v2081_v9 = vmul.f32 -1.442695, %v1401_v58  ;;  %v1404_v45 = vadd.f32 %v1352_v1, %v3743_v7  ;;  %v2083_v19 = vmul.f32 -1.442695, %v1403_v57 }
 0x603   :  { %v1354_v35 = vpop.f32.mrf.mxu0  ;;  %v1397_v20 = vpop.f32.mrf.mxu1  ;;  %v1406_v22 = vadd.f32 %v1395_v12, %v3748_v3 }
 0x604   :  { %2412 = vpow2.f32 %v2081_v9  ;;  %v2080_v15 = vmul.f32 -1.442695, %v1404_v45  ;;  %v1405_v47 = vadd.f32 %v1354_v35, %v3744_v10  ;;  %v1407_v24 = vadd.f32 %v1397_v20, %v3747_v14 }
 0x606   :  { %2414 = vpow2.f32 %v2080_v15  ;;  %v2082_v2 = vmul.f32 -1.442695, %v1405_v47  ;;  %v2084_v58 = vmul.f32 -1.442695, %v1407_v24 }
 0x608   :  { %2416 = vpow2.f32 %v2082_v2 }
 0x609   :  { %2418 = vtanh.f32 %v1402_v16 }
 0x60a   :  { %2420 = vpow2.f32 %v2083_v19 }
 0x60f   :  { %v2411_v59 = vpop.eup %2410 }
 0x610   :  { %v1414_v23 = vadd.f32 1.0, %v2411_v59 }
 0x611   :  { %v2413_v44 = vpop.eup %2412 }
 0x612   :  { %2422 = vrcp.f32 %v1414_v23  ;;  %v1426_v1 = vadd.f32 1.0, %v2413_v44 }
 0x613   :  { %v2415_v9 = vpop.eup %2414  ;;  %2424 = vtanh.f32 %v1406_v22 }
 0x614   :  { %2426 = vrcp.f32 %v1426_v1  ;;  %v1415_v60 = vadd.f32 1.0, %v2415_v9 }
 0x615   :  { %v2417_v7 = vpop.eup %2416  ;;  %2428 = vpow2.f32 %v2084_v58 }
 0x616   :  { %2430 = vrcp.f32 %v1415_v60  ;;  %v1427_v21 = vadd.f32 1.0, %v2417_v7  ;;  %v2419_v45 = vpop.eup %2418 }
 0x617   :  { %v2421_v35 = vpop.eup %2420 }
 0x618   :  { %2432 = vrcp.f32 %v1427_v21  ;;  %v1440_v20 = vadd.f32 1.0, %v2421_v35 }
 0x61a   :  { %2434 = vrcp.f32 %v1440_v20 }
 0x61f   :  { %v2423_v15 = vpop.eup %2422 }
 0x620   :  { %v2425_v10 = vpop.eup %2424  ;;  %v1448_v47 = vmul.f32 %v2423_v15, %v2419_v45 }
 0x621   :  { %v2427_v12 = vpop.eup %2426 }
 0x622   :  { %v2429_v2 = vpop.eup %2428  ;;  %v1446_v54 = vmul.f32 %v2427_v12, %v3481_v61 }
 0x623   :  { %v2431_v57 = vpop.eup %2430  ;;  %v1441_v14 = vadd.f32 1.0, %v2429_v2 }
 0x624   :  { %v3531_v49 = vadd.f32 %v1448_v47, %v1446_v54  ;;  %v1449_v16 = vmul.f32 %v2431_v57, %v2425_v10 }
 0x625   :  { %v2433_v19 = vpop.eup %2432 }
 0x626   :  { %v1447_v24 = vmul.f32 %v2433_v19, %v3484_v46  ;;  %2436 = vtanh.f32 %v3531_v49 }
 0x627   :  { %2438 = vrcp.f32 %v1441_v14  ;;  %v2435_v3 = vpop.eup %2434 }
 0x628   :  { %v3534_v59 = vadd.f32 %v1449_v16, %v1447_v24 }
 0x62a   :  { %2440 = vtanh.f32 %v3534_v59 }
 0x633   :  { %v2437_v22 = vpop.eup %2436 }
 0x634   :  { %v2439_v61 = vpop.eup %2438  ;;  %v1454_v44 = vmul.f32 %v2437_v22, %v2435_v3 }
 0x637   :  { %v2441_v23 = vpop.eup %2440 }
 0x638   :  { %v1455_v58 = vmul.f32 %v2441_v23, %v2439_v61 }
 0x63a   :  { %v1456_v1 = vpack.c.bf16 %v1455_v58, %v1454_v44  ;;  %v2547_v44 = vmov 0.0   ;;  %v2243_v58 = vld [vmem:[%s3661_s4 + $0x30] sm:$0xff]  }
 0x63c   :  { %1490 = vmatmul.mubr.bf16.vlgmr.msra.gmra.mxu0 %v1456_v1  ;;  %1533 = vmatmul.mubr.bf16.vlgmr.msra.gmra.mxu1 %v1456_v1  ;;  %v2244_v1 = vld [vmem:[%s3661_s4 + $0x28] sm:$0xff]  }
 0x63d   :  { %1601 = vmatpush1.bf16.msra.mxu0 %v3241_v51  ;;  %1644 = vmatpush1.bf16.msra.mxu1 %v3247_v25  ;;  %v3749_v51 = vld [vmem:[#allocation36_spill] sm:$0xff] }
 0x63e   :  { %1602 = vmatprep.subr.bf16.mxu0 %v3253_v27  ;;  %1645 = vmatprep.subr.bf16.mxu1 %v3259_v28 }
 0x63f   :  { %1632 = vmatprep.mubr.bf16.mxu0 %v3714_v52  ;;  %1675 = vmatprep.mubr.bf16.mxu1 %v3714_v52 }
 0x641   :  { %1603 = vmatpush1.bf16.msra.mxu0 %v3267_v29  ;;  %1646 = vmatpush1.bf16.msra.mxu1 %v3273_v30  ;;  %v3750_v30 = vld [vmem:[#allocation38_spill] sm:$0xff] }
 0x642   :  { %1604 = vmatprep.subr.bf16.mxu0 %v3279_v31  ;;  %1647 = vmatprep.subr.bf16.mxu1 %v3285_v32 }
 0x645   :  { %1605 = vmatpush1.bf16.msra.mxu0 %v3291_v33  ;;  %1648 = vmatpush1.bf16.msra.mxu1 %v3297_v34 }
 0x646   :  { %1606 = vmatprep.subr.bf16.mxu0 %v3303_v36  ;;  %1649 = vmatprep.subr.bf16.mxu1 %v3309_v37  ;;  %v3751_v36 = vld [vmem:[#allocation40_spill] sm:$0xff] }
 0x649   :  { %1607 = vmatpush1.bf16.msra.mxu0 %v3315_v38  ;;  %1650 = vmatpush1.bf16.msra.mxu1 %v3321_v39 }
 0x64a   :  { %1608 = vmatprep.subr.bf16.mxu0 %v3327_v40  ;;  %1651 = vmatprep.subr.bf16.mxu1 %v3333_v41  ;;  %v3752_v40 = vld [vmem:[#allocation42_spill] sm:$0xff] }
 0x64d   :  { %1609 = vmatpush1.bf16.msra.mxu0 %v3339_v42  ;;  %1652 = vmatpush1.bf16.msra.mxu1 %v3345_v56 }
 0x64e   :  { %1610 = vmatprep.subr.bf16.mxu0 %v3351_v43  ;;  %1653 = vmatprep.subr.bf16.mxu1 %v3357_v13 }
 0x651   :  { %1611 = vmatpush1.bf16.msra.mxu0 %v3363_v48  ;;  %1654 = vmatpush1.bf16.msra.mxu1 %v3369_v50  ;;  %v3753_v48 = vld [vmem:[#allocation44_spill] sm:$0xff] }
 0x652   :  { %1612 = vmatprep.subr.bf16.mxu0 %v3375_v5  ;;  %1655 = vmatprep.subr.bf16.mxu1 %v3381_v0 }
 0x655   :  { %1613 = vmatpush1.bf16.msra.mxu0 %v3387_v63  ;;  %1656 = vmatpush1.bf16.msra.mxu1 %v3453_v18 }
 0x656   :  { %1614 = vmatprep.subr.bf16.mxu0 %v3394_v6  ;;  %1657 = vmatprep.subr.bf16.mxu1 %v3460_v17 }
 0x659   :  { %1615 = vmatpush1.bf16.msra.mxu0 %v3401_v11  ;;  %1658 = vmatpush1.bf16.msra.mxu1 %v3467_v26 }
 0x65a   :  { %2128 = vmatprep.subr.bf16.mxu0 %v2547_v44 }
 0x6fc   :  { %v1491_v52 = vpop.f32.mrf.mxu0  ;;  %v1534_v27 = vpop.f32.mrf.mxu1 }
 0x6fd   :  { %v1543_v25 = vadd.f32 %v1491_v52, %v3749_v51  ;;  %v1545_v50 = vadd.f32 %v1534_v27, %v3753_v48  ;;  %v2245_v52 = vld [vmem:[%s3661_s4 + $0x20] sm:$0xff]   ;;  %v2246_v51 = vld [vmem:[%s3661_s4 + $0x18] sm:$0xff]   ;;  %v2248_v27 = vld [vmem:[%s3661_s4 + $0x8] sm:$0xff]  }
 0x6fe   :  { %v1493_v28 = vpop.f32.mrf.mxu0  ;;  %v1536_v34 = vpop.f32.mrf.mxu1 }
 0x6ff   :  { %v2085_v29 = vmul.f32 -1.442695, %v1543_v25  ;;  %v1544_v31 = vadd.f32 %v1493_v28, %v3750_v30  ;;  %v1546_v43 = vadd.f32 %v1536_v34, %v3092_v8  ;;  %v2247_v25 = vld [vmem:[%s3661_s4 + $0x10] sm:$0xff]   ;;  %v2249_v28 = vld [vmem:[%s3661_s4] sm:$0xff]  }
 0x700   :  { %v1495_v32 = vpop.f32.mrf.mxu0  ;;  %v1538_v42 = vpop.f32.mrf.mxu1  ;;  %v1863_v30 = vld [vmem:[%s3662_s6 + $0x30] sm:$0xff]  ;;  %v3754_v34 = vld [vmem:[#allocation2_spill] sm:$0xff] }
 0x701   :  { %2442 = vpow2.f32 %v2085_v29  ;;  %v2087_v33 = vmul.f32 -1.442695, %v1544_v31  ;;  %v1547_v37 = vadd.f32 %v1495_v32, %v3751_v36  ;;  %v2089_v5 = vmul.f32 -1.442695, %v1546_v43  ;;  %v1864_v29 = vld [vmem:[%s3662_s6 + $0x38] sm:$0xff]  ;;  %v1862_v31 = vld [vmem:[%s3662_s6 + $0x28] sm:$0xff] }
 0x702   :  { %v1497_v38 = vpop.f32.mrf.mxu0  ;;  %v1540_v13 = vpop.f32.mrf.mxu1  ;;  %v1549_v6 = vadd.f32 %v1538_v42, %v3097_v4  ;;  %2148 = vmatprep.subr.mxu1 %v1864_v29  ;;  %v1861_v32 = vld [vmem:[%s3662_s6 + $0x20] sm:$0xff] }
 0x703   :  { %2444 = vpow2.f32 %v2087_v33  ;;  %v2086_v39 = vmul.f32 -1.442695, %v1547_v37  ;;  %v1548_v41 = vadd.f32 %v1497_v38, %v3752_v40  ;;  %v1550_v0 = vadd.f32 %v1540_v13, %v3100_v62  ;;  %v3755_v40 = vld [vmem:[#allocation3_spill] sm:$0xff]  ;;  %v3756_v13 = vld [vmem:[#allocation4_spill] sm:$0xff] }
 0x705   :  { %2446 = vpow2.f32 %v2086_v39  ;;  %v2088_v56 = vmul.f32 -1.442695, %v1548_v41  ;;  %v2090_v17 = vmul.f32 -1.442695, %v1550_v0  ;;  %v3757_v0 = vld [vmem:[#allocation5_spill] sm:$0xff] }
 0x707   :  { %2448 = vpow2.f32 %v2088_v56 }
 0x708   :  { %2450 = vtanh.f32 %v1545_v50 }
 0x709   :  { %2452 = vpow2.f32 %v2089_v5 }
 0x70e   :  { %v2443_v63 = vpop.eup %2442 }
 0x70f   :  { %v1557_v11 = vadd.f32 1.0, %v2443_v63 }
 0x710   :  { %v2445_v18 = vpop.eup %2444 }
 0x711   :  { %2454 = vrcp.f32 %v1557_v11  ;;  %v1569_v26 = vadd.f32 1.0, %v2445_v18 }
 0x712   :  { %v2447_v46 = vpop.eup %2446  ;;  %2456 = vtanh.f32 %v1549_v6 }
 0x713   :  { %2458 = vrcp.f32 %v1569_v26  ;;  %v1558_v8 = vadd.f32 1.0, %v2447_v46 }
 0x714   :  { %v2449_v9 = vpop.eup %2448  ;;  %2460 = vpow2.f32 %v2090_v17 }
 0x715   :  { %2462 = vrcp.f32 %v1558_v8  ;;  %v1570_v60 = vadd.f32 1.0, %v2449_v9  ;;  %v2451_v62 = vpop.eup %2450  ;;  %v3758_v8 = vld [vmem:[#allocation46_spill] sm:$0xff] }
 0x716   :  { %v2453_v7 = vpop.eup %2452 }
 0x717   :  { %2464 = vrcp.f32 %v1570_v60  ;;  %v1583_v12 = vadd.f32 1.0, %v2453_v7 }
 0x719   :  { %2466 = vrcp.f32 %v1583_v12 }
 0x71e   :  { %v2455_v21 = vpop.eup %2454 }
 0x71f   :  { %v2457_v4 = vpop.eup %2456  ;;  %v1591_v45 = vmul.f32 %v2455_v21, %v2451_v62  ;;  %v3759_v62 = vld [vmem:[#allocation45_spill] sm:$0xff] }
 0x720   :  { %v2459_v35 = vpop.eup %2458 }
 0x721   :  { %v2461_v15 = vpop.eup %2460  ;;  %v1589_v10 = vmul.f32 %v2459_v35, %v3531_v49 }
 0x722   :  { %v2463_v47 = vpop.eup %2462  ;;  %v1584_v20 = vadd.f32 1.0, %v2461_v15 }
 0x723   :  { %v3579_v2 = vadd.f32 %v1591_v45, %v1589_v10  ;;  %v1592_v54 = vmul.f32 %v2463_v47, %v2457_v4 }
 0x724   :  { %v2465_v57 = vpop.eup %2464 }
 0x725   :  { %v1590_v16 = vmul.f32 %v2465_v57, %v3534_v59  ;;  %2468 = vtanh.f32 %v3579_v2  ;;  %v2242_v59 = vld [vmem:[%s3661_s4 + $0x38] sm:$0xff]  }
 0x726   :  { %2470 = vrcp.f32 %v1584_v20  ;;  %v2467_v14 = vpop.eup %2466 }
 0x727   :  { %v3582_v19 = vadd.f32 %v1592_v54, %v1590_v16 }
 0x729   :  { %2472 = vtanh.f32 %v3582_v19 }
 0x732   :  { %v2469_v24 = vpop.eup %2468 }
 0x733   :  { %v2471_v49 = vpop.eup %2470  ;;  %v1597_v22 = vmul.f32 %v2469_v24, %v2467_v14 }
 0x736   :  { %v2473_v3 = vpop.eup %2472 }
 0x737   :  { %v1598_v61 = vmul.f32 %v2473_v3, %v2471_v49 }
 0x739   :  { %v1599_v23 = vpack.c.bf16 %v1598_v61, %v1597_v22 }
 0x73b   :  { %1633 = vmatmul.mubr.bf16.vlgmr.msra.gmra.mxu0 %v1599_v23  ;;  %1676 = vmatmul.mubr.bf16.vlgmr.msra.gmra.mxu1 %v1599_v23 }
 0x73c   :  { %2129 = vmatpush3.bf16.msra.mxu0 %v2242_v59  ;;  %2144 = vmatprep.mubr.msk.bf16.mxu0 %vm2548_vm1, %v2547_v44 }
 0x73d   :  { %2130 = vmatprep.subr.bf16.mxu0 %v2547_v44  ;;  %2149 = vmatpush3.msra.mxu1 %v1864_v29 }
 0x73e   :  { %2150 = vmatprep.subr.mxu1 %v1863_v30 }
 0x73f   :  { %2151 = vmatpush3.msra.mxu1 %v1863_v30  ;;  %v1859_v30 = vld [vmem:[%s3662_s6 + $0x10] sm:$0xff] }
 0x740   :  { %2131 = vmatpush3.bf16.msra.mxu0 %v2243_v58  ;;  %2152 = vmatprep.subr.mxu1 %v1862_v31 }
 0x741   :  { %2132 = vmatprep.subr.bf16.mxu0 %v2547_v44  ;;  %2153 = vmatpush3.msra.mxu1 %v1862_v31  ;;  %v1857_v31 = vld [vmem:[%s3662_s6] sm:$0xff] }
 0x742   :  { %2154 = vmatprep.subr.mxu1 %v1861_v32 }
 0x743   :  { %2155 = vmatpush3.msra.mxu1 %v1861_v32  ;;  %v2097_v32 = vld [vmem:[%s3663_s5] ss:$0 sm:$0xff] }
 0x744   :  { %2133 = vmatpush3.bf16.msra.mxu0 %v2244_v1 }
 0x745   :  { %2134 = vmatprep.subr.bf16.mxu0 %v2547_v44 }
 0x748   :  { %2135 = vmatpush3.bf16.msra.mxu0 %v2245_v52 }
 0x749   :  { %2136 = vmatprep.subr.bf16.mxu0 %v2547_v44 }
 0x74c   :  { %2137 = vmatpush3.bf16.msra.mxu0 %v2246_v51 }
 0x74d   :  { %2138 = vmatprep.subr.bf16.mxu0 %v2547_v44 }
 0x750   :  { %2139 = vmatpush3.bf16.msra.mxu0 %v2247_v25 }
 0x751   :  { %2140 = vmatprep.subr.bf16.mxu0 %v2547_v44 }
 0x754   :  { %2141 = vmatpush3.bf16.msra.mxu0 %v2248_v27 }
 0x755   :  { %2142 = vmatprep.subr.bf16.mxu0 %v2547_v44 }
 0x758   :  { %2143 = vmatpush3.bf16.msra.mxu0 %v2249_v28 }
 0x7fb   :  { %v1634_v33 = vpop.f32.mrf.mxu0  ;;  %v1677_v37 = vpop.f32.mrf.mxu1 }
 0x7fc   :  { %v1686_v36 = vadd.f32 %v1634_v33, %v3754_v34  ;;  %v1688_v26 = vadd.f32 %v1677_v37, %v3103_v55 }
 0x7fd   :  { %v1636_v38 = vpop.f32.mrf.mxu0  ;;  %v1679_v43 = vpop.f32.mrf.mxu1 }
 0x7fe   :  { %v2091_v39 = vmul.f32 -1.442695, %v1686_v36  ;;  %v1687_v41 = vadd.f32 %v1636_v38, %v3755_v40  ;;  %v1689_v18 = vadd.f32 %v1679_v43, %v3106_v53 }
 0x7ff   :  { %v1638_v42 = vpop.f32.mrf.mxu0  ;;  %v1681_v6 = vpop.f32.mrf.mxu1 }
 0x800   :  { %2474 = vpow2.f32 %v2091_v39  ;;  %v2093_v56 = vmul.f32 -1.442695, %v1687_v41  ;;  %v1690_v48 = vadd.f32 %v1638_v42, %v3756_v13  ;;  %v2095_v46 = vmul.f32 -1.442695, %v1689_v18 }
 0x801   :  { %v1640_v50 = vpop.f32.mrf.mxu0  ;;  %v1683_v17 = vpop.f32.mrf.mxu1  ;;  %v1692_v7 = vadd.f32 %v1681_v6, %v3759_v62  ;;  %v3760_v13 = vlaneseq }
 0x802   :  { %2476 = vpow2.f32 %v2093_v56  ;;  %v2092_v5 = vmul.f32 -1.442695, %v1690_v48  ;;  %v1691_v63 = vadd.f32 %v1640_v50, %v3757_v0  ;;  %v1693_v9 = vadd.f32 %v1683_v17, %v3758_v8  ;;  %v2106_v56 = vld [vmem:[%s3664_s7] ss:$0 sm:$0xff] }
 0x803   :  { %v1957_v48 = vand.u32 127, %v3760_v13 }
 0x804   :  { %2478 = vpow2.f32 %v2092_v5  ;;  %v2094_v11 = vmul.f32 -1.442695, %v1691_v63  ;;  %v2096_v45 = vmul.f32 -1.442695, %v1693_v9 }
 0x805   :  { %vm1958_vm3 = vcmp.lt.s32.totalorder %v1957_v48, 2 }
 0x806   :  { %2480 = vpow2.f32 %v2094_v11 }
 0x807   :  { %2482 = vtanh.f32 %v1688_v26 }
 0x808   :  { %2484 = vpow2.f32 %v2095_v46 }
 0x80d   :  { %v2475_v60 = vpop.eup %2474 }
 0x80e   :  { %v1700_v21 = vadd.f32 1.0, %v2475_v60 }
 0x80f   :  { %v2477_v4 = vpop.eup %2476 }
 0x810   :  { %2486 = vrcp.f32 %v1700_v21  ;;  %v1712_v35 = vadd.f32 1.0, %v2477_v4 }
 0x811   :  { %v2479_v15 = vpop.eup %2478  ;;  %2488 = vtanh.f32 %v1692_v7 }
 0x812   :  { %2490 = vrcp.f32 %v1712_v35  ;;  %v1701_v53 = vadd.f32 1.0, %v2479_v15 }
 0x813   :  { %v2481_v10 = vpop.eup %2480  ;;  %2492 = vpow2.f32 %v2096_v45 }
 0x814   :  { %2494 = vrcp.f32 %v1701_v53  ;;  %v1713_v55 = vadd.f32 1.0, %v2481_v10  ;;  %v2483_v47 = vpop.eup %2482 }
 0x815   :  { %v2485_v12 = vpop.eup %2484 }
 0x816   :  { %2496 = vrcp.f32 %v1713_v55  ;;  %v1726_v14 = vadd.f32 1.0, %v2485_v12 }
 0x818   :  { %2498 = vrcp.f32 %v1726_v14 }
 0x81d   :  { %v2487_v54 = vpop.eup %2486 }
 0x81e   :  { %v2489_v57 = vpop.eup %2488  ;;  %v1734_v20 = vmul.f32 %v2487_v54, %v2483_v47 }
 0x81f   :  { %v2491_v16 = vpop.eup %2490 }
 0x820   :  { %v2493_v24 = vpop.eup %2492  ;;  %v1732_v49 = vmul.f32 %v2491_v16, %v3579_v2  ;;  %v1860_v2 = vld [vmem:[%s3662_s6 + $0x18] sm:$0xff] }
 0x821   :  { %v2495_v3 = vpop.eup %2494  ;;  %v1727_v59 = vadd.f32 1.0, %v2493_v24  ;;  %2156 = vmatprep.subr.mxu1 %v1860_v2 }
 0x822   :  { %v1736_v22 = vadd.f32 %v1734_v20, %v1732_v49  ;;  %v1735_v61 = vmul.f32 %v2495_v3, %v2489_v57  ;;  %2157 = vmatpush3.msra.mxu1 %v1860_v2 }
 0x823   :  { %v2497_v23 = vpop.eup %2496  ;;  %2158 = vmatprep.subr.mxu1 %v1859_v30 }
 0x824   :  { %2500 = vtanh.f32 %v1736_v22  ;;  %v1733_v44 = vmul.f32 %v2497_v23, %v3582_v19  ;;  %2159 = vmatpush3.msra.mxu1 %v1859_v30  ;;  %v1858_v19 = vld [vmem:[%s3662_s6 + $0x8] sm:$0xff] }
 0x825   :  { %2502 = vrcp.f32 %v1727_v59  ;;  %v2499_v1 = vpop.eup %2498  ;;  %2160 = vmatprep.subr.mxu1 %v1858_v19 }
 0x826   :  { %v1737_v58 = vadd.f32 %v1735_v61, %v1733_v44  ;;  %2161 = vmatpush3.msra.mxu1 %v1858_v19 }
 0x827   :  { %2162 = vmatprep.subr.mxu1 %v1857_v31 }
 0x828   :  { %2504 = vtanh.f32 %v1737_v58  ;;  %2163 = vmatpush3.msra.mxu1 %v1857_v31 }
 0x831   :  { %v2501_v52 = vpop.eup %2500 }
 0x832   :  { %v1740_v51 = vmul.f32 %v2501_v52, %v2499_v1  ;;  %v2503_v25 = vpop.eup %2502 }
 0x835   :  { %v2505_v27 = vpop.eup %2504 }
 0x836   :  { %v1741_v28 = vmul.f32 %v2505_v27, %v2503_v25 }
 0x838   :  { %v1742_v29 = vpack.c.bf16 %v1741_v28, %v1740_v51 }
 0x83a   :  { %2145 = vmatmul.mubr.bf16.vlgmr.msra.gmra.mxu0 %v1742_v29 }
 0x8fa   :  { %v1848_v33 = vpop.f32.mrf.mxu0 }
 0x8fb   :  { %v1849_v34 = vadd.f32 %v2097_v32, %v1848_v33 }
 0x8fc   :  { %v2146_v36 = vpop.f32.mrf.mxu0 }
 0x8fd   :  { %v1855_v37 = vmax.f32 %v1849_v34, 0.0 }
 0x8fe   :  { %v1851_v38 = vpop.f32.mrf.mxu0 }
 0x8ff   :  { %v1852_v39 = vadd.f32 %v2097_v32, %v1851_v38  ;;  %2164 = vmatprep.mubr.msk.f32.mxu1 %vm1872_vm2, %v1855_v37 }
 0x900   :  { %v2147_v40 = vpop.f32.mrf.mxu0 }
 0x901   :  { %v1856_v41 = vmax.f32 %v1852_v39, 0.0 }
 0x903   :  { %2165 = vmatmul.mubr.msk.f32.vlgmr.msra.gmra.mxu1 %vm1872_vm2, %v1856_v41 }
 0x9c3   :  { %v2166_v42 = vpop.f32.mrf.mxu1 }
 0x9c4   :  { %v1951_v50 = vadd.f32 %v2166_v42, %v2106_v56 }
 0x9c5   :  { %v1945_v43 = vpop.f32.mrf.mxu1 }
 0x9c6   :  { %v1946_v5 = vadd.f32 %v2106_v56, %v1945_v43  ;;  %v1955_v63 = vmax.f32 %v1951_v50, 0.0 }
 0x9c8   :  { %v1954_v0 = vmax.f32 %v1946_v5, 0.0  ;;  %v1960_v11 = vsel %vm1958_vm3, %v1955_v63, -inf }
 0x9ca   :  { %v1959_v6 = vsel %vm1958_vm3, %v1954_v0, -inf }
 0x9cb   :  { %1961 = vmax.xlane.f32.xlu0 %v1959_v6 }
 0x9cf   :  { %1963 = vmax.xlane.f32.xlu0 %v1960_v11 }
 0xa54   :  { %v1962_v18 = vpop.xlane.xlu0 %1961 }
 0xa55   :  { %v1965_v17 = vsub.f32 %v1959_v6, %v1962_v18 }
 0xa57   :  { %v1967_v26 = vmul.f32 1.442695, %v1965_v17 }
 0xa58   :  { %v1964_v46 = vpop.xlane.xlu0 %1963 }
 0xa59   :  { %2506 = vpow2.f32 %v1967_v26  ;;  %v1966_v8 = vsub.f32 %v1960_v11, %v1964_v46 }
 0xa5b   :  { %v1969_v9 = vmul.f32 1.442695, %v1966_v8 }
 0xa5d   :  { %2508 = vpow2.f32 %v1969_v9 }
 0xa66   :  { %v2507_v60 = vpop.eup %2506 }
 0xa67   :  { %1971 = vadd.xlane.f32.xlu1 %v2507_v60 }
 0xa6a   :  { %v2509_v62 = vpop.eup %2508 }
 0xa6b   :  { %1973 = vadd.xlane.f32.xlu1 %v2509_v62 }
 0xaf0   :  { %v1972_v7 = vpop.xlane.xlu1 %1971 }
 0xaf1   :  { %2510 = vrcp.f32 %v1972_v7 }
 0xaf4   :  { %v1974_v21 = vpop.xlane.xlu1 %1973 }
 0xaf5   :  { %2512 = vrcp.f32 %v1974_v21 }
 0xafe   :  { %v2511_v4 = vpop.eup %2510 }
 0xaff   :  { %v1977_v45 = vmul.f32 %v2511_v4, %v2507_v60 }
 0xb01   :  { %1979 = vst [vmem:[%s3665_s8] sm:$0xff] %v1977_v45 }
 0xb02   :  { %v2513_v35 = vpop.eup %2512 }
 0xb03   :  { %v1978_v15 = vmul.f32 %v2513_v35, %v2509_v62 }
 0xb05   :  { %1980 = vst [vmem:[%s3665_s8 + $0x8] sm:$0xff] %v1978_v15 }

</bundles_post_ra>
